<compile_context>
chip_gen: v5e
topology: v5e:2x2
jax: 0.10.0
libtpu: 0.0.40
codegen_flags: <defaults>
</compile_context>

<pallas_src>
import jax
import jax.numpy as jnp
import numpy as np
from jax.experimental import pallas as pl
from jax.experimental.pallas import tpu as pltpu

# ---- stand-ins for the module-level hyperparameter constants ----
CONV_LAYERS = 2
PADDING = 0
DILATION = 1
KERNEL_SIZE = 3
STRIDE = 1
FILTERS = [2]            # channel multiplier per layer (broadcast to all layers)
INPUT_SHAPE = (8, 8, 8)  # (D, H, W)
INPUT_CHANNELS = 1
OUTPUT_SIZE = 1
BATCH = 2

_LANE = 128
_SUBLANE = 8


def _out_dim(i, p, d, k, s):
    # mirrors get_out_dims for a single spatial axis
    return ((i - 1 + 2 * p - d * (k - 1)) // s) + 1


def _round_up(x, m):
    return ((x + m - 1) // m) * m


def _pick_tile_b(n):
    """Batch tile: 128 rows saturate v5e's 4x128 MXU; 256 matches v6e/v7x's 256-wide MXU."""
    try:
        kind = jax.devices()[0].device_kind.lower()
    except Exception:
        kind = ""
    cap = 128 if any(t in kind for t in ("v2", "v3", "v4", "v5 lite", "v5e")) else 256
    return min(cap, max(_SUBLANE, _round_up(n, _SUBLANE)))


# ---------------------------------------------------------------------------
# Fused Pallas kernel: relu(conv GEMM) x L -> relu(fc1) -> tanh(fc2) -> relu(fc3)
# One batch tile per grid step; all GEMM matrices stay VMEM-resident (their
# index_map always returns block (0,0)). All MACs run on the MXU in bf16 with
# f32 accumulation; bias/activation epilogue stays f32 on the VPU/EUP.
# ---------------------------------------------------------------------------
def _fused_forward_kernel(*refs):
    x_ref, o_ref = refs[0], refs[-1]
    mid = refs[1:-1]
    n_conv = (len(mid) - 6) // 2

    h = x_ref[...]                                      # (TILE_B, in_pad) f32, lane-dense

    # grouped Conv3d layers lowered to lane-dense GEMMs (Toeplitz weight matrices)
    for l in range(n_conv):
        m_ref, b_ref = mid[2 * l], mid[2 * l + 1]
        h = jnp.dot(h.astype(m_ref.dtype), m_ref[...],
                    preferred_element_type=jnp.float32) + b_ref[...]
        h = jnp.maximum(h, 0.0)                         # conv activation: relu

    # x.view(-1, fc_input_size) is implicit: rows are already NCDHW-flattened.
    # (dropout = identity, inference mode)
    w1, b1, w2, b2, w3, b3 = mid[2 * n_conv:]
    h = jnp.maximum(jnp.dot(h.astype(w1.dtype), w1[...],
                            preferred_element_type=jnp.float32) + b1[...], 0.0)
    h = jnp.tanh(jnp.dot(h.astype(w2.dtype), w2[...],
                         preferred_element_type=jnp.float32) + b2[...])
    h = jnp.maximum(jnp.dot(h.astype(w3.dtype), w3[...],
                            preferred_element_type=jnp.float32) + b3[...], 0.0)
    o_ref[...] = h.astype(o_ref.dtype)                  # (TILE_B, 128) unmasked store


@jax.jit
def mapnet_forward(x, fused):
    """Full MAPnet forward as a single fused, batch-tiled Pallas kernel call."""
    n = x.shape[0]
    x2d = x.reshape(n, -1).astype(jnp.float32)          # NCDHW row-major flatten
    in_real = x2d.shape[1]
    in_pad = fused["conv"][0][0].shape[0]               # padded rows of conv-1 GEMM
    out_pad = fused["w3"].shape[1]                      # lane-padded output width (128)

    tile_b = _pick_tile_b(n)
    n_pad = _round_up(max(n, tile_b), tile_b)
    # pad batch rows to a full tile and input columns to the lane-padded width
    x2d = jnp.pad(x2d, ((0, n_pad - n), (0, in_pad - in_real)))

    weight_args = [a for mb in fused["conv"] for a in mb] + [
        fused["w1"], fused["b1"], fused["w2"], fused["b2"], fused["w3"], fused["b3"]]

    def _resident_spec(a):
        # whole-array block, constant index_map -> DMA'd once, VMEM-resident across steps
        return pl.BlockSpec(a.shape, lambda i: (0, 0),
                            memory_space=pltpu.MemorySpace.VMEM)

    grid_spec = pltpu.PrefetchScalarGridSpec(
        num_scalar_prefetch=0,
        grid=(n_pad // tile_b,),
        in_specs=[pl.BlockSpec((tile_b, in_pad), lambda i: (i, 0),
                               memory_space=pltpu.MemorySpace.VMEM)]
                 + [_resident_spec(a) for a in weight_args],
        out_specs=pl.BlockSpec((tile_b, out_pad), lambda i: (i, 0),
                               memory_space=pltpu.MemorySpace.VMEM),
    )

    out = pl.pallas_call(
        _fused_forward_kernel,
        out_shape=jax.ShapeDtypeStruct((n_pad, out_pad), jnp.float32),
        grid_spec=grid_spec,
        compiler_params=pltpu.CompilerParams(
            dimension_semantics=("parallel",)),         # v7x: shard batch tiles over 2 TCs
    )(x2d, *weight_args)
    return out[:n, :OUTPUT_SIZE]                        # drop batch / lane padding


# ---------------------------------------------------------------------------
# Host-side (one-time) weight preprocessing
# ---------------------------------------------------------------------------
def _conv3d_group_to_gemm(w, b, c_in, mult, in_dims, out_dims, k, stride, pad, dil):
    """Lower a grouped (groups == c_in, channel-multiplier) Conv3d to a dense GEMM.

    Returns (M, b_exp) such that  y_flat = x_flat @ M + b_exp, where x_flat / y_flat
    are the NCDHW row-major flattenings of a single sample's input / output.
    """
    D, H, W = in_dims
    Do, Ho, Wo = out_dims
    p_in, p_out = D * H * W, Do * Ho * Wo
    c_out = c_in * mult
    w = np.asarray(w, np.float32)
    mat = np.zeros((c_in * p_in, c_out * p_out), np.float32)
    wo = np.arange(Wo)
    for co in range(c_out):
        ci = co // mult                    # groups == c_in: one input channel per group
        for kd in range(k):
            for kh in range(k):
                for kw in range(k):
                    wv = w[co, kd, kh, kw]
                    for do in range(Do):
                        i_d = do * stride + kd * dil - pad
                        if i_d < 0 or i_d >= D:
                            continue
                        for ho in range(Ho):
                            i_h = ho * stride + kh * dil - pad
                            if i_h < 0 or i_h >= H:
                                continue
                            i_w = wo * stride + kw * dil - pad
                            ok = (i_w >= 0) & (i_w < W)
                            rows = ci * p_in + (i_d * H + i_h) * W + i_w[ok]
                            cols = co * p_out + (do * Ho + ho) * Wo + wo[ok]
                            mat[rows, cols] = wv
    b_exp = np.repeat(np.asarray(b, np.float32), p_out)[None, :]
    return mat, b_exp


def _pad2d(a, rows, cols):
    a = np.asarray(a, np.float32)
    return np.pad(a, ((0, rows - a.shape[0]), (0, cols - a.shape[1])))


def build_fused_params(params):
    """Precompute conv-as-GEMM matrices (lane-padded, bf16) and padded FC weights.

    Padding invariant: layer L's GEMM columns and bias are zero-padded to a lane
    multiple, and layer L+1's GEMM rows are zero-padded to the same width, so
    the padded (always-zero) activation columns contribute nothing downstream.
    """
    fused = {"conv": []}
    first = params["conv"][0]
    prev_pad = _round_up(first["in_channels"] * int(np.prod(first["in_dims"])), _LANE)

    for layer in params["conv"]:
        m, b_exp = _conv3d_group_to_gemm(
            layer["w"], layer["b"], layer["in_channels"], layer["mult"],
            layer["in_dims"], layer["out_dims"], layer["k"],
            STRIDE, PADDING, DILATION)
        cols_pad = _round_up(m.shape[1], _LANE)
        m_p = _pad2d(m, prev_pad, cols_pad)
        b_p = _pad2d(b_exp, 1, cols_pad)
        fused["conv"].append((jnp.asarray(m_p, jnp.bfloat16),
                              jnp.asarray(b_p, jnp.float32)))
        prev_pad = cols_pad

    fc = params["fc"]
    h1 = fc["w1"].shape[1]
    h2 = fc["w2"].shape[1]
    h1p = _round_up(h1, _LANE)
    h2p = _round_up(h2, _LANE)
    op = _round_up(OUTPUT_SIZE, _LANE)
    fused["w1"] = jnp.asarray(_pad2d(fc["w1"], prev_pad, h1p), jnp.bfloat16)
    fused["b1"] = jnp.asarray(_pad2d(fc["b1"], 1, h1p), jnp.float32)
    fused["w2"] = jnp.asarray(_pad2d(fc["w2"], h1p, h2p), jnp.bfloat16)
    fused["b2"] = jnp.asarray(_pad2d(fc["b2"], 1, h2p), jnp.float32)
    fused["w3"] = jnp.asarray(_pad2d(fc["w3"], h2p, op), jnp.bfloat16)
    fused["b3"] = jnp.asarray(_pad2d(fc["b3"], 1, op), jnp.float32)
    return fused


# ---------------------------------------------------------------------------
# Parameter construction (deterministic, synthetic — mirrors __init__ shapes)
# ---------------------------------------------------------------------------
def init_params(key):
    filters = FILTERS * CONV_LAYERS if len(FILTERS) == 1 else FILTERS
    params = {"conv": []}
    c_in = INPUT_CHANNELS
    dims = tuple(INPUT_SHAPE)
    for i in range(CONV_LAYERS):
        mult = int(filters[i])
        c_out = c_in * mult
        key, kw, kb = jax.random.split(key, 3)
        # PyTorch Conv3d(groups=c_in) weight: (c_out, 1, K, K, K) with the I dim squeezed
        w = jax.random.normal(
            kw, (c_out, KERNEL_SIZE, KERNEL_SIZE, KERNEL_SIZE), jnp.float32) * 0.1
        b = jax.random.normal(kb, (c_out,), jnp.float32) * 0.1
        out_dims = tuple(_out_dim(d, PADDING, DILATION, KERNEL_SIZE, STRIDE) for d in dims)
        params["conv"].append(dict(w=w, b=b, mult=mult, k=KERNEL_SIZE,
                                   in_channels=c_in, in_dims=dims, out_dims=out_dims))
        c_in = c_out
        dims = out_dims

    fc_in = c_in * dims[0] * dims[1] * dims[2]
    h1 = fc_in // 2
    key, k1, k2, k3, k4, k5, k6 = jax.random.split(key, 7)
    params["fc"] = dict(
        w1=jax.random.normal(k1, (fc_in, h1), jnp.float32) * 0.05,
        b1=jax.random.normal(k2, (1, h1), jnp.float32) * 0.05,
        w2=jax.random.normal(k3, (h1, 100), jnp.float32) * 0.05,
        b2=jax.random.normal(k4, (1, 100), jnp.float32) * 0.05,
        w3=jax.random.normal(k5, (100, OUTPUT_SIZE), jnp.float32) * 0.05,
        b3=jax.random.normal(k6, (1, OUTPUT_SIZE), jnp.float32) * 0.05,
    )
    params["fc_input_size"] = fc_in
    return params


# ---------------------------------------------------------------------------
# Pure-NumPy reference of the PyTorch forward (dropout = identity)
# ---------------------------------------------------------------------------
def reference_forward(x, params):
    h = np.asarray(x, np.float32)
    for layer in params["conv"]:
        w = np.asarray(layer["w"], np.float32)
        b = np.asarray(layer["b"], np.float32)
        mult, k = layer["mult"], layer["k"]
        Do, Ho, Wo = layer["out_dims"]
        n, c_in = h.shape[0], h.shape[1]
        hp = np.pad(h, ((0, 0), (0, 0)) + ((PADDING, PADDING),) * 3)
        out = np.zeros((n, c_in * mult, Do, Ho, Wo), np.float32)
        for co in range(c_in * mult):
            ci = co // mult
            acc = np.zeros((n, Do, Ho, Wo), np.float32)
            for kd in range(k):
                for kh in range(k):
                    for kw in range(k):
                        sl = tuple(
                            slice(kk * DILATION,
                                  kk * DILATION + (oo - 1) * STRIDE + 1, STRIDE)
                            for kk, oo in ((kd, Do), (kh, Ho), (kw, Wo)))
                        acc += w[co, kd, kh, kw] * hp[(slice(None), ci) + sl]
            out[:, co] = np.maximum(acc + b[co], 0.0)
        h = out
    h = h.reshape(h.shape[0], -1)
    fc = params["fc"]
    h = np.maximum(h @ np.asarray(fc["w1"]) + np.asarray(fc["b1"]), 0.0)
    h = np.tanh(h @ np.asarray(fc["w2"]) + np.asarray(fc["b2"]))
    h = np.maximum(h @ np.asarray(fc["w3"]) + np.asarray(fc["b3"]), 0.0)
    return h


if __name__ == "__main__":
    key = jax.random.PRNGKey(0)
    key, kx, kp = jax.random.split(key, 3)
    x = jax.random.normal(kx, (BATCH, INPUT_CHANNELS) + INPUT_SHAPE, jnp.float32)
    params = init_params(kp)
    fused = build_fused_params(params)

    out = mapnet_forward(x, fused)
    out = jax.block_until_ready(out)

    assert out.shape == (BATCH, OUTPUT_SIZE), out.shape
    assert bool(jnp.all(jnp.isfinite(out)))

    # numerical check against a pure-NumPy f32 reference of the PyTorch forward
    # (slightly looser atol to account for bf16 weight storage)
    ref = reference_forward(np.asarray(x), params)
    np.testing.assert_allclose(np.asarray(out), ref, rtol=5e-2, atol=2e-2)

    print("KERNEL_OK")
</pallas_src>

<mosaic_0001>
module attributes {stable_mosaic.version = 11 : i64} {
  func.func @_fused_forward_kernel(%arg0: i32, %arg1: memref<8x512xf32, #tpu.memory_space<vmem>>, %arg2: memref<512x512xbf16, #tpu.memory_space<vmem>>, %arg3: memref<1x512xf32, #tpu.memory_space<vmem>>, %arg4: memref<512x256xbf16, #tpu.memory_space<vmem>>, %arg5: memref<1x256xf32, #tpu.memory_space<vmem>>, %arg6: memref<256x128xbf16, #tpu.memory_space<vmem>>, %arg7: memref<1x128xf32, #tpu.memory_space<vmem>>, %arg8: memref<128x128xbf16, #tpu.memory_space<vmem>>, %arg9: memref<1x128xf32, #tpu.memory_space<vmem>>, %arg10: memref<128x128xbf16, #tpu.memory_space<vmem>>, %arg11: memref<1x128xf32, #tpu.memory_space<vmem>>, %arg12: memref<8x128xf32, #tpu.memory_space<vmem>>) attributes {dimension_semantics = [#tpu.dimension_semantics<parallel>], iteration_bounds = array<i64: 1>, scalar_prefetch = 0 : i64, scratch_operands = 0 : i64, tpu.core_type = #tpu.core_type<tc>, window_params = [{transform_indices = @transform_0, window_bounds = array<i64: 8, 512>}, {pipeline_mode = #tpu.pipeline_mode<synchronous>, transform_indices = @transform_1, window_bounds = array<i64: 512, 512>}, {pipeline_mode = #tpu.pipeline_mode<synchronous>, transform_indices = @transform_2, window_bounds = array<i64: 1, 512>}, {pipeline_mode = #tpu.pipeline_mode<synchronous>, transform_indices = @transform_3, window_bounds = array<i64: 512, 256>}, {pipeline_mode = #tpu.pipeline_mode<synchronous>, transform_indices = @transform_4, window_bounds = array<i64: 1, 256>}, {pipeline_mode = #tpu.pipeline_mode<synchronous>, transform_indices = @transform_5, window_bounds = array<i64: 256, 128>}, {pipeline_mode = #tpu.pipeline_mode<synchronous>, transform_indices = @transform_6, window_bounds = array<i64: 1, 128>}, {pipeline_mode = #tpu.pipeline_mode<synchronous>, transform_indices = @transform_7, window_bounds = array<i64: 128, 128>}, {pipeline_mode = #tpu.pipeline_mode<synchronous>, transform_indices = @transform_8, window_bounds = array<i64: 1, 128>}, {pipeline_mode = #tpu.pipeline_mode<synchronous>, transform_indices = @transform_9, window_bounds = array<i64: 128, 128>}, {pipeline_mode = #tpu.pipeline_mode<synchronous>, transform_indices = @transform_10, window_bounds = array<i64: 1, 128>}, {transform_indices = @transform_11, window_bounds = array<i64: 8, 128>}]} {
    %c0 = arith.constant 0 : index
    %c0_0 = arith.constant 0 : index
    %0 = vector.load %arg1[%c0, %c0_0] : memref<8x512xf32, #tpu.memory_space<vmem>>, vector<8x512xf32>
    %1 = arith.truncf %0 : vector<8x512xf32> to vector<8x512xbf16>
    %c0_1 = arith.constant 0 : index
    %c0_2 = arith.constant 0 : index
    %2 = vector.load %arg2[%c0_1, %c0_2] : memref<512x512xbf16, #tpu.memory_space<vmem>>, vector<512x512xbf16>
    %cst = arith.constant dense<0.000000e+00> : vector<8x512xf32>
    %3 = tpu.matmul %1, %2, %cst {dimension_numbers = #tpu.dot_dimension_numbers<[1], [0], [0], [1], [0, 0, 1, 1], [], []>} : vector<8x512xbf16>, vector<512x512xbf16>, vector<8x512xf32> -> vector<8x512xf32>
    %c0_3 = arith.constant 0 : index
    %c0_4 = arith.constant 0 : index
    %4 = vector.load %arg3[%c0_3, %c0_4] : memref<1x512xf32, #tpu.memory_space<vmem>>, vector<1x512xf32>
    %5 = vector.broadcast %4 : vector<1x512xf32> to vector<8x512xf32>
    %6 = arith.addf %3, %5 : vector<8x512xf32>
    %cst_5 = arith.constant 0.000000e+00 : f32
    %7 = vector.broadcast %cst_5 : f32 to vector<8x512xf32>
    %8 = arith.maximumf %6, %7 : vector<8x512xf32>
    %9 = arith.truncf %8 : vector<8x512xf32> to vector<8x512xbf16>
    %c0_6 = arith.constant 0 : index
    %c0_7 = arith.constant 0 : index
    %10 = vector.load %arg4[%c0_6, %c0_7] : memref<512x256xbf16, #tpu.memory_space<vmem>>, vector<512x256xbf16>
    %cst_8 = arith.constant dense<0.000000e+00> : vector<8x256xf32>
    %11 = tpu.matmul %9, %10, %cst_8 {dimension_numbers = #tpu.dot_dimension_numbers<[1], [0], [0], [1], [0, 0, 1, 1], [], []>} : vector<8x512xbf16>, vector<512x256xbf16>, vector<8x256xf32> -> vector<8x256xf32>
    %c0_9 = arith.constant 0 : index
    %c0_10 = arith.constant 0 : index
    %12 = vector.load %arg5[%c0_9, %c0_10] : memref<1x256xf32, #tpu.memory_space<vmem>>, vector<1x256xf32>
    %13 = vector.broadcast %12 : vector<1x256xf32> to vector<8x256xf32>
    %14 = arith.addf %11, %13 : vector<8x256xf32>
    %cst_11 = arith.constant 0.000000e+00 : f32
    %15 = vector.broadcast %cst_11 : f32 to vector<8x256xf32>
    %16 = arith.maximumf %14, %15 : vector<8x256xf32>
    %17 = arith.truncf %16 : vector<8x256xf32> to vector<8x256xbf16>
    %c0_12 = arith.constant 0 : index
    %c0_13 = arith.constant 0 : index
    %18 = vector.load %arg6[%c0_12, %c0_13] : memref<256x128xbf16, #tpu.memory_space<vmem>>, vector<256x128xbf16>
    %cst_14 = arith.constant dense<0.000000e+00> : vector<8x128xf32>
    %19 = tpu.matmul %17, %18, %cst_14 {dimension_numbers = #tpu.dot_dimension_numbers<[1], [0], [0], [1], [0, 0, 1, 1], [], []>} : vector<8x256xbf16>, vector<256x128xbf16>, vector<8x128xf32> -> vector<8x128xf32>
    %c0_15 = arith.constant 0 : index
    %c0_16 = arith.constant 0 : index
    %20 = vector.load %arg7[%c0_15, %c0_16] : memref<1x128xf32, #tpu.memory_space<vmem>>, vector<1x128xf32>
    %21 = vector.broadcast %20 : vector<1x128xf32> to vector<8x128xf32>
    %22 = arith.addf %19, %21 : vector<8x128xf32>
    %cst_17 = arith.constant 0.000000e+00 : f32
    %23 = vector.broadcast %cst_17 : f32 to vector<8x128xf32>
    %24 = arith.maximumf %22, %23 : vector<8x128xf32>
    %25 = arith.truncf %24 : vector<8x128xf32> to vector<8x128xbf16>
    %c0_18 = arith.constant 0 : index
    %c0_19 = arith.constant 0 : index
    %26 = vector.load %arg8[%c0_18, %c0_19] : memref<128x128xbf16, #tpu.memory_space<vmem>>, vector<128x128xbf16>
    %cst_20 = arith.constant dense<0.000000e+00> : vector<8x128xf32>
    %27 = tpu.matmul %25, %26, %cst_20 {dimension_numbers = #tpu.dot_dimension_numbers<[1], [0], [0], [1], [0, 0, 1, 1], [], []>} : vector<8x128xbf16>, vector<128x128xbf16>, vector<8x128xf32> -> vector<8x128xf32>
    %c0_21 = arith.constant 0 : index
    %c0_22 = arith.constant 0 : index
    %28 = vector.load %arg9[%c0_21, %c0_22] : memref<1x128xf32, #tpu.memory_space<vmem>>, vector<1x128xf32>
    %29 = vector.broadcast %28 : vector<1x128xf32> to vector<8x128xf32>
    %30 = arith.addf %27, %29 : vector<8x128xf32>
    %31 = math.tanh %30 : vector<8x128xf32>
    %32 = arith.truncf %31 : vector<8x128xf32> to vector<8x128xbf16>
    %c0_23 = arith.constant 0 : index
    %c0_24 = arith.constant 0 : index
    %33 = vector.load %arg10[%c0_23, %c0_24] : memref<128x128xbf16, #tpu.memory_space<vmem>>, vector<128x128xbf16>
    %cst_25 = arith.constant dense<0.000000e+00> : vector<8x128xf32>
    %34 = tpu.matmul %32, %33, %cst_25 {dimension_numbers = #tpu.dot_dimension_numbers<[1], [0], [0], [1], [0, 0, 1, 1], [], []>} : vector<8x128xbf16>, vector<128x128xbf16>, vector<8x128xf32> -> vector<8x128xf32>
    %c0_26 = arith.constant 0 : index
    %c0_27 = arith.constant 0 : index
    %35 = vector.load %arg11[%c0_26, %c0_27] : memref<1x128xf32, #tpu.memory_space<vmem>>, vector<1x128xf32>
    %36 = vector.broadcast %35 : vector<1x128xf32> to vector<8x128xf32>
    %37 = arith.addf %34, %36 : vector<8x128xf32>
    %cst_28 = arith.constant 0.000000e+00 : f32
    %38 = vector.broadcast %cst_28 : f32 to vector<8x128xf32>
    %39 = arith.maximumf %37, %38 : vector<8x128xf32>
    %c0_29 = arith.constant 0 : index
    %c0_30 = arith.constant 0 : index
    %40 = vector.load %arg12[%c0_29, %c0_30] : memref<8x128xf32, #tpu.memory_space<vmem>>, vector<8x128xf32>
    tpu.vector_store %arg12[%c0_29, %c0_30], %39 {strides = array<i32>} : memref<8x128xf32, #tpu.memory_space<vmem>>, vector<8x128xf32>,
    return
  }
  func.func @transform_0(%arg0: i32) -> (i32, i32) {
    %c0_i32 = arith.constant 0 : i32
    %c0_i32_0 = arith.constant 0 : i32
    return %arg0, %c0_i32 : i32, i32
  }
  func.func @transform_1(%arg0: i32) -> (i32, i32) {
    %c0_i32 = arith.constant 0 : i32
    %c0_i32_0 = arith.constant 0 : i32
    %c0_i32_1 = arith.constant 0 : i32
    return %c0_i32, %c0_i32_0 : i32, i32
  }
  func.func @transform_2(%arg0: i32) -> (i32, i32) {
    %c0_i32 = arith.constant 0 : i32
    %c0_i32_0 = arith.constant 0 : i32
    %c0_i32_1 = arith.constant 0 : i32
    return %c0_i32, %c0_i32_0 : i32, i32
  }
  func.func @transform_3(%arg0: i32) -> (i32, i32) {
    %c0_i32 = arith.constant 0 : i32
    %c0_i32_0 = arith.constant 0 : i32
    %c0_i32_1 = arith.constant 0 : i32
    return %c0_i32, %c0_i32_0 : i32, i32
  }
  func.func @transform_4(%arg0: i32) -> (i32, i32) {
    %c0_i32 = arith.constant 0 : i32
    %c0_i32_0 = arith.constant 0 : i32
    %c0_i32_1 = arith.constant 0 : i32
    return %c0_i32, %c0_i32_0 : i32, i32
  }
  func.func @transform_5(%arg0: i32) -> (i32, i32) {
    %c0_i32 = arith.constant 0 : i32
    %c0_i32_0 = arith.constant 0 : i32
    %c0_i32_1 = arith.constant 0 : i32
    return %c0_i32, %c0_i32_0 : i32, i32
  }
  func.func @transform_6(%arg0: i32) -> (i32, i32) {
    %c0_i32 = arith.constant 0 : i32
    %c0_i32_0 = arith.constant 0 : i32
    %c0_i32_1 = arith.constant 0 : i32
    return %c0_i32, %c0_i32_0 : i32, i32
  }
  func.func @transform_7(%arg0: i32) -> (i32, i32) {
    %c0_i32 = arith.constant 0 : i32
    %c0_i32_0 = arith.constant 0 : i32
    %c0_i32_1 = arith.constant 0 : i32
    return %c0_i32, %c0_i32_0 : i32, i32
  }
  func.func @transform_8(%arg0: i32) -> (i32, i32) {
    %c0_i32 = arith.constant 0 : i32
    %c0_i32_0 = arith.constant 0 : i32
    %c0_i32_1 = arith.constant 0 : i32
    return %c0_i32, %c0_i32_0 : i32, i32
  }
  func.func @transform_9(%arg0: i32) -> (i32, i32) {
    %c0_i32 = arith.constant 0 : i32
    %c0_i32_0 = arith.constant 0 : i32
    %c0_i32_1 = arith.constant 0 : i32
    return %c0_i32, %c0_i32_0 : i32, i32
  }
  func.func @transform_10(%arg0: i32) -> (i32, i32) {
    %c0_i32 = arith.constant 0 : i32
    %c0_i32_0 = arith.constant 0 : i32
    %c0_i32_1 = arith.constant 0 : i32
    return %c0_i32, %c0_i32_0 : i32, i32
  }
  func.func @transform_11(%arg0: i32) -> (i32, i32) {
    %c0_i32 = arith.constant 0 : i32
    %c0_i32_0 = arith.constant 0 : i32
    return %arg0, %c0_i32 : i32, i32
  }
}

</mosaic_0001>

<bundles_post_ra>
// kernel: mapnet_forward.1
= control target key start
LH: loop header
LB: loop body
LE: loop exit
PB: predicated region body
PF: predicated region fallthrough
CT: control target
= control target key end

     0   :  { %16 = vsyncpa [#allocation3], 0  ;;  %s3361_s0 = inlined_call_operand.vmem [shape: f32[8,512], index: 0, kind: input, shape index: {}]   ;;  %s3362_s1 = inlined_call_operand.hbm [shape: bf16[512,512], index: 1, kind: input, shape index: {}]   ;;  %s3363_s2 = inlined_call_operand.vmem [shape: f32[1,512], index: 2, kind: input, shape index: {}]   ;;  %s3364_s3 = inlined_call_operand.hbm [shape: bf16[512,256], index: 3, kind: input, shape index: {}]   ;;  %s3365_s4 = inlined_call_operand.vmem [shape: f32[1,256], index: 4, kind: input, shape index: {}]   ;;  %s3366_s5 = inlined_call_operand.vmem [shape: bf16[256,128], index: 5, kind: input, shape index: {}]   ;;  %s3367_s6 = inlined_call_operand.vmem [shape: f32[1,128], index: 6, kind: input, shape index: {}]   ;;  %s3368_s7 = inlined_call_operand.hbm [shape: bf16[128,128], index: 7, kind: input, shape index: {}]   ;;  %s3369_s8 = inlined_call_operand.vmem [shape: f32[1,128], index: 8, kind: input, shape index: {}]   ;;  %s3370_s9 = inlined_call_operand.hbm [shape: bf16[128,128], index: 9, kind: input, shape index: {}]   ;;  %s3371_s10 = inlined_call_operand.vmem [shape: f32[1,128], index: 10, kind: input, shape index: {}]   ;;  %s3372_s11 = inlined_call_operand.vmem [shape: f32[8,128], index: 11, kind: output, shape index: {}]  }
   0x1   :  { %17 = vsyncpa [#allocation5], 0  ;;  %s40_s19 = sshll.u32 %s3364_s3, 4  ;;  %s41_s19 = int_to_ptr.hbm [resolvable:$true] %s40_s19 }
   0x2   :  { %18 = vsyncpa [#allocation8], 0  ;;  %s3171_s20 = smov [#allocation4]   ;;  %s25_s24 = sshll.u32 %s3362_s1, 4  ;;  %s26_s24 = int_to_ptr.hbm [resolvable:$true] %s25_s24 }
   0x3   :  { %s42_s21 = sshll.u32 %s3171_s20, 4  ;;  %s3172_s25 = smov 128   ;;  %s43_s21 = int_to_ptr.vmem [resolvable:$true] %s42_s21 }
   0x4   :  { %s3173_s26 = smov 8   ;;  %s3174_s27 = smov [#allocation2]  }
   0x5   :  { %48 = dma.hbm_to_vmem [thread:$0]  %s41_s19, 8192, %s43_s21, [#allocation5], %s3172_s25, %s3172_s25, %s3173_s26  }
   0x6   :  { %s27_s28 = sshll.u32 %s3174_s27, 4  ;;  %s3175_s29 = smov 256   ;;  %s28_s28 = int_to_ptr.vmem [resolvable:$true] %s27_s28 }
   0x7   :  { %s3176_s30 = smov 16   ;;  %s59_s13 = sshll.u32 %s3368_s7, 4  ;;  %s60_s13 = int_to_ptr.hbm [resolvable:$true] %s59_s13 }
   0x8   :  { %33 = dma.hbm_to_vmem [thread:$0]  %s26_s24, 16384, %s28_s28, [#allocation3], %s3175_s29, %s3175_s29, %s3176_s30  }
   0x9   :  { %s3177_s14 = smov [#allocation6]   ;;  %s74_s17 = sshll.u32 %s3370_s9, 4  ;;  %s75_s17 = int_to_ptr.hbm [resolvable:$true] %s74_s17 }
   0xa   :  { %s61_s15 = sshll.u32 %s3177_s14, 4  ;;  %s3178_s18 = smov 64   ;;  %s62_s15 = int_to_ptr.vmem [resolvable:$true] %s61_s15 }
   0xb   :  { %s3179_s19 = smov 4   ;;  %s3180_s20 = smov [#allocation7]  }
   0xc   :  { %67 = dma.hbm_to_vmem [thread:$0]  %s60_s13, 1024, %s62_s15, [#allocation5], %s3178_s18, %s3178_s18, %s3179_s19  }
   0xd   :  { %s76_s21 = sshll.u32 %s3180_s20, 4  ;;  %s77_s21 = int_to_ptr.vmem [resolvable:$true] %s76_s21 }
   0xe   :  { %82 = dma.hbm_to_vmem [thread:$0]  %s75_s17, 1024, %s77_s21, [#allocation8], %s3178_s18, %s3178_s18, %s3179_s19  }
   0xf   :  { %3165 = dma.done.wait [#allocation3], 16384  }
  0x10   :  { %3166 = vsyncadd [#allocation3], 4294950912 }
  0x11   :  { %3167 = dma.done.wait [#allocation5], 9216  }
  0x12   :  { %3168 = vsyncadd [#allocation5], 4294958080 }
  0x13   :  { %3169 = dma.done.wait [#allocation8], 1024  }
  0x14   :  { %3170 = vsyncadd [#allocation8], 4294966272  ;;  %v2048_v0 = vld [vmem:[#allocation2 + $0xe0] sm:$0xf]  ;;  %v2860_v1 = vld [vmem:[#allocation2 + $0xec] sm:$0xf0] }
  0x15   :  { %v2176_v2 = vld [vmem:[#allocation2 + $0x1e0] sm:$0xf]  ;;  %v2049_v3 = vor.u32 %v2860_v1, %v2048_v0  ;;  %v2892_v4 = vld [vmem:[#allocation2 + $0x1ec] sm:$0xf0] }
  0x16   :  { %v2304_v5 = vld [vmem:[#allocation2 + $0x2e0] sm:$0xf]  ;;  %v2924_v6 = vld [vmem:[#allocation2 + $0x2ec] sm:$0xf0]  ;;  %v2177_v7 = vor.u32 %v2892_v4, %v2176_v2 }
  0x17   :  { %v2305_v8 = vor.u32 %v2924_v6, %v2304_v5  ;;  %v2432_v9 = vld [vmem:[#allocation2 + $0x3e0] sm:$0xf]  ;;  %v2956_v10 = vld [vmem:[#allocation2 + $0x3ec] sm:$0xf0]  ;;  %887 = vmatpush.bf16.msra.mxu0 %v2049_v3 }
  0x18   :  { %v2032_v11 = vld [vmem:[#allocation2 + $0xc0] sm:$0xf]  ;;  %v2433_v12 = vor.u32 %v2956_v10, %v2432_v9  ;;  %v2856_v13 = vld [vmem:[#allocation2 + $0xcc] sm:$0xf0]  ;;  %900 = vmatpush.bf16.msra.mxu1 %v2177_v7 }
  0x19   :  { %v2160_v14 = vld [vmem:[#allocation2 + $0x1c0] sm:$0xf]  ;;  %v2888_v15 = vld [vmem:[#allocation2 + $0x1cc] sm:$0xf0]  ;;  %913 = vmatpush.bf16.msra.mxu2 %v2305_v8  ;;  %v2033_v16 = vor.u32 %v2856_v13, %v2032_v11 }
  0x1a   :  { %v2161_v17 = vor.u32 %v2888_v15, %v2160_v14  ;;  %v2288_v18 = vld [vmem:[#allocation2 + $0x2c0] sm:$0xf]  ;;  %v2920_v19 = vld [vmem:[#allocation2 + $0x2cc] sm:$0xf0]  ;;  %926 = vmatpush.bf16.msra.mxu3 %v2433_v12 }
  0x1b   :  { %v2416_v20 = vld [vmem:[#allocation2 + $0x3c0] sm:$0xf]  ;;  %v2289_v21 = vor.u32 %v2920_v19, %v2288_v18  ;;  %v2952_v22 = vld [vmem:[#allocation2 + $0x3cc] sm:$0xf0]  ;;  %888 = vmatpush.bf16.msra.mxu0 %v2033_v16 }
  0x1c   :  { %v2016_v23 = vld [vmem:[#allocation2 + $0xa0] sm:$0xf]  ;;  %v2852_v24 = vld [vmem:[#allocation2 + $0xac] sm:$0xf0]  ;;  %v2417_v25 = vor.u32 %v2952_v22, %v2416_v20  ;;  %901 = vmatpush.bf16.msra.mxu1 %v2161_v17 }
  0x1d   :  { %v2144_v26 = vld [vmem:[#allocation2 + $0x1a0] sm:$0xf]  ;;  %v2884_v27 = vld [vmem:[#allocation2 + $0x1ac] sm:$0xf0]  ;;  %v2017_v29 = vor.u32 %v2852_v24, %v2016_v23  ;;  %914 = vmatpush.bf16.msra.mxu2 %v2289_v21 }
  0x1e   :  { %v2272_v28 = vld [vmem:[#allocation2 + $0x2a0] sm:$0xf]  ;;  %v2916_v30 = vld [vmem:[#allocation2 + $0x2ac] sm:$0xf0]  ;;  %v2145_v33 = vor.u32 %v2884_v27, %v2144_v26  ;;  %927 = vmatpush.bf16.msra.mxu3 %v2417_v25 }
  0x1f   :  { %v2400_v31 = vld [vmem:[#allocation2 + $0x3a0] sm:$0xf]  ;;  %v2948_v32 = vld [vmem:[#allocation2 + $0x3ac] sm:$0xf0]  ;;  %v2273_v34 = vor.u32 %v2916_v30, %v2272_v28  ;;  %889 = vmatpush.bf16.msra.mxu0 %v2017_v29  ;;  %v2858_v28 = vld [vmem:[#allocation2 + $0xe4] sm:$0xf] }
  0x20   :  { %v2000_v35 = vld [vmem:[#allocation2 + $0x80] sm:$0xf]  ;;  %v2848_v36 = vld [vmem:[#allocation2 + $0x8c] sm:$0xf0]  ;;  %v2401_v38 = vor.u32 %v2948_v32, %v2400_v31  ;;  %902 = vmatpush.bf16.msra.mxu1 %v2145_v33  ;;  %v2050_v29 = vld [vmem:[#allocation2 + $0xf0] sm:$0xf0] }
  0x21   :  { %v2128_v37 = vld [vmem:[#allocation2 + $0x180] sm:$0xf]  ;;  %v2880_v39 = vld [vmem:[#allocation2 + $0x18c] sm:$0xf0]  ;;  %v2001_v44 = vor.u32 %v2848_v36, %v2000_v35  ;;  %915 = vmatpush.bf16.msra.mxu2 %v2273_v34  ;;  %v2890_v30 = vld [vmem:[#allocation2 + $0x1e4] sm:$0xf] }
  0x22   :  { %v2256_v40 = vld [vmem:[#allocation2 + $0x280] sm:$0xf]  ;;  %v2912_v41 = vld [vmem:[#allocation2 + $0x28c] sm:$0xf0]  ;;  %v2129_v45 = vor.u32 %v2880_v39, %v2128_v37  ;;  %928 = vmatpush.bf16.msra.mxu3 %v2401_v38  ;;  %v2178_v32 = vld [vmem:[#allocation2 + $0x1f0] sm:$0xf0] }
  0x23   :  { %v2384_v42 = vld [vmem:[#allocation2 + $0x380] sm:$0xf]  ;;  %v2944_v43 = vld [vmem:[#allocation2 + $0x38c] sm:$0xf0]  ;;  %v2257_v46 = vor.u32 %v2912_v41, %v2256_v40  ;;  %890 = vmatpush.bf16.msra.mxu0 %v2001_v44  ;;  %v2922_v33 = vld [vmem:[#allocation2 + $0x2e4] sm:$0xf]  ;;  %v2053_v41 = vor.u32 %v2858_v28, %v2050_v29 }
  0x24   :  { %v1984_v47 = vld [vmem:[#allocation2 + $0x60] sm:$0xf]  ;;  %v2844_v48 = vld [vmem:[#allocation2 + $0x6c] sm:$0xf0]  ;;  %v2385_v50 = vor.u32 %v2944_v43, %v2384_v42  ;;  %903 = vmatpush.bf16.msra.mxu1 %v2129_v45  ;;  %v2306_v34 = vld [vmem:[#allocation2 + $0x2f0] sm:$0xf0]  ;;  %v2181_v45 = vor.u32 %v2890_v30, %v2178_v32 }
  0x25   :  { %v2112_v49 = vld [vmem:[#allocation2 + $0x160] sm:$0xf]  ;;  %v2876_v51 = vld [vmem:[#allocation2 + $0x16c] sm:$0xf0]  ;;  %v1985_v56 = vor.u32 %v2844_v48, %v1984_v47  ;;  %916 = vmatpush.bf16.msra.mxu2 %v2257_v46  ;;  %v2954_v37 = vld [vmem:[#allocation2 + $0x3e4] sm:$0xf]  ;;  %v2309_v46 = vor.u32 %v2922_v33, %v2306_v34 }
  0x26   :  { %v2240_v52 = vld [vmem:[#allocation2 + $0x260] sm:$0xf]  ;;  %v2908_v53 = vld [vmem:[#allocation2 + $0x26c] sm:$0xf0]  ;;  %v2113_v57 = vor.u32 %v2876_v51, %v2112_v49  ;;  %929 = vmatpush.bf16.msra.mxu3 %v2385_v50  ;;  %v2434_v38 = vld [vmem:[#allocation2 + $0x3f0] sm:$0xf0] }
  0x27   :  { %v2368_v54 = vld [vmem:[#allocation2 + $0x360] sm:$0xf]  ;;  %v2940_v55 = vld [vmem:[#allocation2 + $0x36c] sm:$0xf0]  ;;  %v2241_v58 = vor.u32 %v2908_v53, %v2240_v52  ;;  %891 = vmatpush.bf16.msra.mxu0 %v1985_v56  ;;  %v2854_v42 = vld [vmem:[#allocation2 + $0xc4] sm:$0xf]  ;;  %v2437_v50 = vor.u32 %v2954_v37, %v2434_v38 }
  0x28   :  { %v1968_v59 = vld [vmem:[#allocation2 + $0x40] sm:$0xf]  ;;  %v2840_v60 = vld [vmem:[#allocation2 + $0x4c] sm:$0xf0]  ;;  %v2369_v62 = vor.u32 %v2940_v55, %v2368_v54  ;;  %904 = vmatpush.bf16.msra.mxu1 %v2113_v57  ;;  %v104_v44 = vld [vmem:[%s3361_s0 + $0x18] sm:$0xff] }
  0x29   :  { %v2096_v61 = vld [vmem:[#allocation2 + $0x140] sm:$0xf]  ;;  %v2872_v63 = vld [vmem:[#allocation2 + $0x14c] sm:$0xf0]  ;;  %v1969_v4 = vor.u32 %v2840_v60, %v1968_v59  ;;  %917 = vmatpush.bf16.msra.mxu2 %v2241_v58  ;;  %v2034_v47 = vld [vmem:[#allocation2 + $0xd0] sm:$0xf0]  ;;  %v3269_v58 = vpack.c.bf16 %v104_v44, %v104_v44 }
  0x2a   :  { %v2224_v0 = vld [vmem:[#allocation2 + $0x240] sm:$0xf]  ;;  %v2904_v1 = vld [vmem:[#allocation2 + $0x24c] sm:$0xf0]  ;;  %v2097_v5 = vor.u32 %v2872_v63, %v2096_v61  ;;  %930 = vmatpush.bf16.msra.mxu3 %v2369_v62  ;;  %v2886_v48 = vld [vmem:[#allocation2 + $0x1c4] sm:$0xf]  ;;  %v2037_v59 = vor.u32 %v2854_v42, %v2034_v47 }
  0x2b   :  { %v2352_v2 = vld [vmem:[#allocation2 + $0x340] sm:$0xf]  ;;  %v2936_v3 = vld [vmem:[#allocation2 + $0x34c] sm:$0xf0]  ;;  %v2225_v6 = vor.u32 %v2904_v1, %v2224_v0  ;;  %892 = vmatpush.bf16.msra.mxu0 %v1969_v4  ;;  %v102_v49 = vld [vmem:[%s3361_s0 + $0x8] sm:$0xff] }
  0x2c   :  { %v1952_v7 = vld [vmem:[#allocation2 + $0x20] sm:$0xf]  ;;  %v2836_v8 = vld [vmem:[#allocation2 + $0x2c] sm:$0xf0]  ;;  %v2353_v10 = vor.u32 %v2936_v3, %v2352_v2  ;;  %905 = vmatpush.bf16.msra.mxu1 %v2097_v5  ;;  %v2162_v51 = vld [vmem:[#allocation2 + $0x1d0] sm:$0xf0]  ;;  %v3271_v60 = vpack.c.bf16 %v102_v49, %v102_v49 }
  0x2d   :  { %v2080_v9 = vld [vmem:[#allocation2 + $0x120] sm:$0xf]  ;;  %v2868_v11 = vld [vmem:[#allocation2 + $0x12c] sm:$0xf0]  ;;  %v1953_v16 = vor.u32 %v2836_v8, %v1952_v7  ;;  %918 = vmatpush.bf16.msra.mxu2 %v2225_v6  ;;  %v2918_v52 = vld [vmem:[#allocation2 + $0x2c4] sm:$0xf]  ;;  %v2165_v61 = vor.u32 %v2886_v48, %v2162_v51 }
  0x2e   :  { %v2208_v12 = vld [vmem:[#allocation2 + $0x220] sm:$0xf]  ;;  %v2900_v13 = vld [vmem:[#allocation2 + $0x22c] sm:$0xf0]  ;;  %v2081_v19 = vor.u32 %v2868_v11, %v2080_v9  ;;  %931 = vmatpush.bf16.msra.mxu3 %v2353_v10  ;;  %v2290_v53 = vld [vmem:[#allocation2 + $0x2d0] sm:$0xf0] }
  0x2f   :  { %v2336_v14 = vld [vmem:[#allocation2 + $0x320] sm:$0xf]  ;;  %v2932_v15 = vld [vmem:[#allocation2 + $0x32c] sm:$0xf0]  ;;  %v2209_v20 = vor.u32 %v2900_v13, %v2208_v12  ;;  %893 = vmatpush.bf16.msra.mxu0 %v1953_v16  ;;  %v2950_v55 = vld [vmem:[#allocation2 + $0x3c4] sm:$0xf]  ;;  %v2293_v62 = vor.u32 %v2918_v52, %v2290_v53 }
  0x30   :  { %v1936_v17 = vld [vmem:[#allocation2] sm:$0xf]  ;;  %v2832_v18 = vld [vmem:[#allocation2 + $0xc] sm:$0xf0]  ;;  %v2337_v24 = vor.u32 %v2932_v15, %v2336_v14  ;;  %906 = vmatpush.bf16.msra.mxu1 %v2081_v19  ;;  %v2418_v56 = vld [vmem:[#allocation2 + $0x3d0] sm:$0xf0] }
  0x31   :  { %v2064_v21 = vld [vmem:[#allocation2 + $0x100] sm:$0xf]  ;;  %v2864_v22 = vld [vmem:[#allocation2 + $0x10c] sm:$0xf0]  ;;  %v1937_v31 = vor.u32 %v2832_v18, %v1936_v17  ;;  %919 = vmatpush.bf16.msra.mxu2 %v2209_v20  ;;  %v2850_v63 = vld [vmem:[#allocation2 + $0xa4] sm:$0xf]  ;;  %v2421_v2 = vor.u32 %v2950_v55, %v2418_v56 }
  0x32   :  { %v2192_v23 = vld [vmem:[#allocation2 + $0x200] sm:$0xf]  ;;  %v2896_v25 = vld [vmem:[#allocation2 + $0x20c] sm:$0xf0]  ;;  %v2065_v35 = vor.u32 %v2864_v22, %v2064_v21  ;;  %932 = vmatpush.bf16.msra.mxu3 %v2337_v24  ;;  %v2018_v0 = vld [vmem:[#allocation2 + $0xb0] sm:$0xf0] }
  0x33   :  { %v2320_v26 = vld [vmem:[#allocation2 + $0x300] sm:$0xf]  ;;  %v2928_v27 = vld [vmem:[#allocation2 + $0x30c] sm:$0xf0]  ;;  %v2193_v36 = vor.u32 %v2896_v25, %v2192_v23  ;;  %894 = vmatpush.bf16.msra.mxu0 %v1937_v31  ;;  %v2882_v1 = vld [vmem:[#allocation2 + $0x1a4] sm:$0xf]  ;;  %v2021_v8 = vor.u32 %v2850_v63, %v2018_v0 }
  0x34   :  { %v103_v39 = vld [vmem:[%s3361_s0 + $0x10] sm:$0xff]  ;;  %v2321_v40 = vor.u32 %v2928_v27, %v2320_v26  ;;  %v101_v43 = vld [vmem:[%s3361_s0] sm:$0xff]  ;;  %907 = vmatpush.bf16.msra.mxu1 %v2065_v35 }
  0x35   :  { %v3265_v54 = vpack.c.bf16 %v103_v39, %v103_v39  ;;  %920 = vmatpush.bf16.msra.mxu2 %v2193_v36  ;;  %v3267_v57 = vpack.c.bf16 %v101_v43, %v101_v43  ;;  %v2146_v3 = vld [vmem:[#allocation2 + $0x1b0] sm:$0xf0]  ;;  %v2914_v4 = vld [vmem:[#allocation2 + $0x2a4] sm:$0xf] }
  0x36   :  { %933 = vmatpush.bf16.msra.mxu3 %v2321_v40  ;;  %v2274_v5 = vld [vmem:[#allocation2 + $0x2b0] sm:$0xf0]  ;;  %v2946_v6 = vld [vmem:[#allocation2 + $0x3a4] sm:$0xf]  ;;  %v2149_v9 = vor.u32 %v2882_v1, %v2146_v3 }
  0x37   :  { %939 = vmatpush.bf16.msrb.mxu0 %v2053_v41  ;;  %v2402_v7 = vld [vmem:[#allocation2 + $0x3b0] sm:$0xf0]  ;;  %908 = vmatmul.bf16.vlgmr.msra.gmra.mxu1 %v3271_v60  ;;  %v2277_v10 = vor.u32 %v2914_v4, %v2274_v5  ;;  %v2846_v11 = vld [vmem:[#allocation2 + $0x84] sm:$0xf] }
  0x38   :  { %952 = vmatpush.bf16.msrb.mxu1 %v2181_v45  ;;  %921 = vmatmul.bf16.vlgmr.msra.gmra.mxu2 %v3265_v54  ;;  %v2002_v12 = vld [vmem:[#allocation2 + $0x90] sm:$0xf0]  ;;  %v2878_v13 = vld [vmem:[#allocation2 + $0x184] sm:$0xf]  ;;  %v2405_v14 = vor.u32 %v2946_v6, %v2402_v7 }
  0x39   :  { %965 = vmatpush.bf16.msrb.mxu2 %v2309_v46  ;;  %895 = vmatmul.bf16.vlgmr.msra.gmra.mxu0 %v3267_v57  ;;  %v2130_v15 = vld [vmem:[#allocation2 + $0x190] sm:$0xf0]  ;;  %v2910_v16 = vld [vmem:[#allocation2 + $0x284] sm:$0xf]  ;;  %v2005_v20 = vor.u32 %v2846_v11, %v2002_v12  ;;  %v2893_v12 = vld [vmem:[#allocation2 + $0x1f4] sm:$0xf0] }
  0x3a   :  { %978 = vmatpush.bf16.msrb.mxu3 %v2437_v50  ;;  %v2258_v17 = vld [vmem:[#allocation2 + $0x290] sm:$0xf0]  ;;  %v2942_v18 = vld [vmem:[#allocation2 + $0x384] sm:$0xf]  ;;  %v2133_v21 = vor.u32 %v2878_v13, %v2130_v15  ;;  %v2312_v13 = vld [vmem:[#allocation2 + $0x2e8] sm:$0xf] }
  0x3b   :  { %934 = vmatmul.bf16.vlgmr.msra.gmra.mxu3 %v3269_v58  ;;  %940 = vmatpush.bf16.msrb.mxu0 %v2037_v59  ;;  %v2386_v19 = vld [vmem:[#allocation2 + $0x390] sm:$0xf0]  ;;  %v2261_v22 = vor.u32 %v2910_v16, %v2258_v17  ;;  %v2842_v23 = vld [vmem:[#allocation2 + $0x64] sm:$0xf]  ;;  %v2440_v17 = vld [vmem:[#allocation2 + $0x3e8] sm:$0xf] }
  0x3c   :  { %953 = vmatpush.bf16.msrb.mxu1 %v2165_v61  ;;  %v1986_v24 = vld [vmem:[#allocation2 + $0x70] sm:$0xf0]  ;;  %v2874_v25 = vld [vmem:[#allocation2 + $0x164] sm:$0xf]  ;;  %v2389_v26 = vor.u32 %v2942_v18, %v2386_v19  ;;  %v2957_v18 = vld [vmem:[#allocation2 + $0x3f4] sm:$0xf0] }
  0x3d   :  { %966 = vmatpush.bf16.msrb.mxu2 %v2293_v62  ;;  %v2114_v27 = vld [vmem:[#allocation2 + $0x170] sm:$0xf0]  ;;  %v2906_v28 = vld [vmem:[#allocation2 + $0x264] sm:$0xf]  ;;  %v1989_v32 = vor.u32 %v2842_v23, %v1986_v24  ;;  %v2040_v23 = vld [vmem:[#allocation2 + $0xc8] sm:$0xf] }
  0x3e   :  { %979 = vmatpush.bf16.msrb.mxu3 %v2421_v2  ;;  %v2242_v29 = vld [vmem:[#allocation2 + $0x270] sm:$0xf0]  ;;  %v2938_v30 = vld [vmem:[#allocation2 + $0x364] sm:$0xf]  ;;  %v2117_v33 = vor.u32 %v2874_v25, %v2114_v27  ;;  %v2857_v24 = vld [vmem:[#allocation2 + $0xd4] sm:$0xf0] }
  0x3f   :  { %941 = vmatpush.bf16.msrb.mxu0 %v2021_v8  ;;  %v2370_v31 = vld [vmem:[#allocation2 + $0x370] sm:$0xf0]  ;;  %v2245_v34 = vor.u32 %v2906_v28, %v2242_v29  ;;  %v2838_v35 = vld [vmem:[#allocation2 + $0x44] sm:$0xf]  ;;  %v2056_v8 = vld [vmem:[#allocation2 + $0xe8] sm:$0xf] }
  0x40   :  { %954 = vmatpush.bf16.msrb.mxu1 %v2149_v9  ;;  %v1970_v36 = vld [vmem:[#allocation2 + $0x50] sm:$0xf0]  ;;  %v2870_v37 = vld [vmem:[#allocation2 + $0x144] sm:$0xf]  ;;  %v2373_v38 = vor.u32 %v2938_v30, %v2370_v31  ;;  %v2861_v9 = vld [vmem:[#allocation2 + $0xf4] sm:$0xf0] }
  0x41   :  { %967 = vmatpush.bf16.msrb.mxu2 %v2277_v10  ;;  %v2098_v39 = vld [vmem:[#allocation2 + $0x150] sm:$0xf0]  ;;  %v2902_v40 = vld [vmem:[#allocation2 + $0x244] sm:$0xf]  ;;  %v1973_v44 = vor.u32 %v2838_v35, %v1970_v36  ;;  %v2184_v10 = vld [vmem:[#allocation2 + $0x1e8] sm:$0xf] }
  0x42   :  { %980 = vmatpush.bf16.msrb.mxu3 %v2405_v14  ;;  %v2226_v41 = vld [vmem:[#allocation2 + $0x250] sm:$0xf0]  ;;  %v2934_v42 = vld [vmem:[#allocation2 + $0x344] sm:$0xf]  ;;  %v2101_v45 = vor.u32 %v2870_v37, %v2098_v39  ;;  %v2925_v14 = vld [vmem:[#allocation2 + $0x2f4] sm:$0xf0] }
  0x43   :  { %942 = vmatpush.bf16.msrb.mxu0 %v2005_v20  ;;  %v2354_v43 = vld [vmem:[#allocation2 + $0x350] sm:$0xf0]  ;;  %v2229_v46 = vor.u32 %v2902_v40, %v2226_v41  ;;  %v2834_v47 = vld [vmem:[#allocation2 + $0x24] sm:$0xf]  ;;  %v2057_v20 = vor.u32 %v2861_v9, %v2056_v8  ;;  %v2168_v25 = vld [vmem:[#allocation2 + $0x1c8] sm:$0xf] }
  0x44   :  { %955 = vmatpush.bf16.msrb.mxu1 %v2133_v21  ;;  %v1954_v48 = vld [vmem:[#allocation2 + $0x30] sm:$0xf0]  ;;  %v2866_v49 = vld [vmem:[#allocation2 + $0x124] sm:$0xf]  ;;  %v2357_v50 = vor.u32 %v2934_v42, %v2354_v43  ;;  %v2185_v21 = vor.u32 %v2893_v12, %v2184_v10  ;;  %v2889_v27 = vld [vmem:[#allocation2 + $0x1d4] sm:$0xf0] }
  0x45   :  { %968 = vmatpush.bf16.msrb.mxu2 %v2261_v22  ;;  %v2082_v51 = vld [vmem:[#allocation2 + $0x130] sm:$0xf0]  ;;  %v2898_v52 = vld [vmem:[#allocation2 + $0x224] sm:$0xf]  ;;  %v1957_v59 = vor.u32 %v2834_v47, %v1954_v48  ;;  %v2313_v22 = vor.u32 %v2925_v14, %v2312_v13  ;;  %v2296_v28 = vld [vmem:[#allocation2 + $0x2c8] sm:$0xf] }
  0x46   :  { %981 = vmatpush.bf16.msrb.mxu3 %v2389_v26  ;;  %v2210_v53 = vld [vmem:[#allocation2 + $0x230] sm:$0xf0]  ;;  %v2930_v55 = vld [vmem:[#allocation2 + $0x324] sm:$0xf]  ;;  %v2085_v63 = vor.u32 %v2866_v49, %v2082_v51  ;;  %v2441_v26 = vor.u32 %v2957_v18, %v2440_v17  ;;  %v2921_v29 = vld [vmem:[#allocation2 + $0x2d4] sm:$0xf0] }
  0x47   :  { %943 = vmatpush.bf16.msrb.mxu0 %v1989_v32  ;;  %v2338_v56 = vld [vmem:[#allocation2 + $0x330] sm:$0xf0]  ;;  %v2830_v61 = vld [vmem:[#allocation2 + $0x4] sm:$0xf]  ;;  %v2213_v0 = vor.u32 %v2898_v52, %v2210_v53  ;;  %v2424_v30 = vld [vmem:[#allocation2 + $0x3c8] sm:$0xf]  ;;  %v2041_v32 = vor.u32 %v2857_v24, %v2040_v23 }
  0x48   :  { %956 = vmatpush.bf16.msrb.mxu1 %v2117_v33  ;;  %v1938_v62 = vld [vmem:[#allocation2 + $0x10] sm:$0xf0]  ;;  %v2862_v1 = vld [vmem:[#allocation2 + $0x104] sm:$0xf]  ;;  %v2341_v4 = vor.u32 %v2930_v55, %v2338_v56  ;;  %v2953_v31 = vld [vmem:[#allocation2 + $0x3d4] sm:$0xf0]  ;;  %v2169_v33 = vor.u32 %v2889_v27, %v2168_v25 }
  0x49   :  { %969 = vmatpush.bf16.msrb.mxu2 %v2245_v34  ;;  %v2066_v2 = vld [vmem:[#allocation2 + $0x110] sm:$0xf0]  ;;  %v2894_v3 = vld [vmem:[#allocation2 + $0x204] sm:$0xf]  ;;  %v1941_v11 = vor.u32 %v2830_v61, %v1938_v62  ;;  %v2297_v34 = vor.u32 %v2921_v29, %v2296_v28  ;;  %v2024_v35 = vld [vmem:[#allocation2 + $0xa8] sm:$0xf] }
  0x4a   :  { %982 = vmatpush.bf16.msrb.mxu3 %v2373_v38  ;;  %v2194_v5 = vld [vmem:[#allocation2 + $0x210] sm:$0xf0]  ;;  %v2926_v6 = vld [vmem:[#allocation2 + $0x304] sm:$0xf]  ;;  %v2069_v15 = vor.u32 %v2862_v1, %v2066_v2  ;;  %v2853_v36 = vld [vmem:[#allocation2 + $0xb4] sm:$0xf0]  ;;  %v2425_v38 = vor.u32 %v2953_v31, %v2424_v30 }
  0x4b   :  { %944 = vmatpush.bf16.msrb.mxu0 %v1973_v44  ;;  %v2322_v7 = vld [vmem:[#allocation2 + $0x310] sm:$0xf0]  ;;  %v2197_v16 = vor.u32 %v2894_v3, %v2194_v5  ;;  %v2152_v37 = vld [vmem:[#allocation2 + $0x1a8] sm:$0xf]  ;;  %v2885_v39 = vld [vmem:[#allocation2 + $0x1b4] sm:$0xf0]  ;;  %v2025_v44 = vor.u32 %v2853_v36, %v2024_v35 }
  0x4c   :  { %957 = vmatpush.bf16.msrb.mxu1 %v2101_v45  ;;  %v2325_v19 = vor.u32 %v2926_v6, %v2322_v7  ;;  %v2280_v40 = vld [vmem:[#allocation2 + $0x2a8] sm:$0xf]  ;;  %v2917_v41 = vld [vmem:[#allocation2 + $0x2b4] sm:$0xf0]  ;;  %v2153_v45 = vor.u32 %v2885_v39, %v2152_v37 }
  0x4d   :  { %970 = vmatpush.bf16.msrb.mxu2 %v2229_v46  ;;  %v2408_v42 = vld [vmem:[#allocation2 + $0x3a8] sm:$0xf]  ;;  %v2949_v43 = vld [vmem:[#allocation2 + $0x3b4] sm:$0xf0]  ;;  %v2281_v46 = vor.u32 %v2917_v41, %v2280_v40 }
  0x4e   :  { %983 = vmatpush.bf16.msrb.mxu3 %v2357_v50  ;;  %v2008_v47 = vld [vmem:[#allocation2 + $0x88] sm:$0xf]  ;;  %v2849_v48 = vld [vmem:[#allocation2 + $0x94] sm:$0xf0]  ;;  %v2409_v50 = vor.u32 %v2949_v43, %v2408_v42 }
  0x4f   :  { %945 = vmatpush.bf16.msrb.mxu0 %v1957_v59  ;;  %v2136_v49 = vld [vmem:[#allocation2 + $0x188] sm:$0xf]  ;;  %v2881_v51 = vld [vmem:[#allocation2 + $0x194] sm:$0xf0]  ;;  %v2009_v59 = vor.u32 %v2849_v48, %v2008_v47  ;;  %v2186_v48 = vld [vmem:[#allocation2 + $0x1f8] sm:$0xf0] }
  0x50   :  { %958 = vmatpush.bf16.msrb.mxu1 %v2085_v63  ;;  %v2264_v52 = vld [vmem:[#allocation2 + $0x288] sm:$0xf]  ;;  %v2913_v53 = vld [vmem:[#allocation2 + $0x294] sm:$0xf0]  ;;  %v2137_v61 = vor.u32 %v2881_v51, %v2136_v49  ;;  %v2923_v49 = vld [vmem:[#allocation2 + $0x2ec] sm:$0xf] }
  0x51   :  { %971 = vmatpush.bf16.msrb.mxu2 %v2213_v0  ;;  %v2392_v55 = vld [vmem:[#allocation2 + $0x388] sm:$0xf]  ;;  %v2945_v56 = vld [vmem:[#allocation2 + $0x394] sm:$0xf0]  ;;  %v2265_v62 = vor.u32 %v2913_v53, %v2264_v52  ;;  %v2955_v53 = vld [vmem:[#allocation2 + $0x3ec] sm:$0xf] }
  0x52   :  { %984 = vmatpush.bf16.msrb.mxu3 %v2341_v4  ;;  %v1992_v63 = vld [vmem:[#allocation2 + $0x68] sm:$0xf]  ;;  %v2845_v0 = vld [vmem:[#allocation2 + $0x74] sm:$0xf0]  ;;  %v2393_v2 = vor.u32 %v2945_v56, %v2392_v55  ;;  %v2442_v55 = vld [vmem:[#allocation2 + $0x3f8] sm:$0xf0] }
  0x53   :  { %946 = vmatpush.bf16.msrb.mxu0 %v1941_v11  ;;  %v2120_v1 = vld [vmem:[#allocation2 + $0x168] sm:$0xf]  ;;  %v2877_v3 = vld [vmem:[#allocation2 + $0x174] sm:$0xf0]  ;;  %v1993_v8 = vor.u32 %v2845_v0, %v1992_v63  ;;  %v2855_v63 = vld [vmem:[#allocation2 + $0xcc] sm:$0xf] }
  0x54   :  { %959 = vmatpush.bf16.msrb.mxu1 %v2069_v15  ;;  %v2248_v4 = vld [vmem:[#allocation2 + $0x268] sm:$0xf]  ;;  %v2909_v5 = vld [vmem:[#allocation2 + $0x274] sm:$0xf0]  ;;  %v2121_v9 = vor.u32 %v2877_v3, %v2120_v1  ;;  %v2042_v0 = vld [vmem:[#allocation2 + $0xd8] sm:$0xf0] }
  0x55   :  { %972 = vmatpush.bf16.msrb.mxu2 %v2197_v16  ;;  %v2376_v6 = vld [vmem:[#allocation2 + $0x368] sm:$0xf]  ;;  %v2941_v7 = vld [vmem:[#allocation2 + $0x374] sm:$0xf0]  ;;  %v2249_v10 = vor.u32 %v2909_v5, %v2248_v4  ;;  %v2887_v1 = vld [vmem:[#allocation2 + $0x1cc] sm:$0xf] }
  0x56   :  { %985 = vmatpush.bf16.msrb.mxu3 %v2325_v19  ;;  %947 = vmatmul.bf16.vlgmr.msrb.gmra.mxu0 %v3267_v57  ;;  %v1976_v11 = vld [vmem:[#allocation2 + $0x48] sm:$0xf]  ;;  %v2841_v12 = vld [vmem:[#allocation2 + $0x54] sm:$0xf0]  ;;  %v2377_v14 = vor.u32 %v2941_v7, %v2376_v6  ;;  %v2170_v3 = vld [vmem:[#allocation2 + $0x1d8] sm:$0xf0] }
  0x57   :  { %991 = vmatpush.bf16.msra.mxu0 %v2057_v20  ;;  %960 = vmatmul.bf16.vlgmr.msrb.gmra.mxu1 %v3271_v60  ;;  %v2104_v13 = vld [vmem:[#allocation2 + $0x148] sm:$0xf]  ;;  %v2873_v15 = vld [vmem:[#allocation2 + $0x154] sm:$0xf0]  ;;  %v1977_v20 = vor.u32 %v2841_v12, %v1976_v11  ;;  %v2919_v4 = vld [vmem:[#allocation2 + $0x2cc] sm:$0xf] }
  0x58   :  { %1004 = vmatpush.bf16.msra.mxu1 %v2185_v21  ;;  %973 = vmatmul.bf16.vlgmr.msrb.gmra.mxu2 %v3265_v54  ;;  %v2232_v16 = vld [vmem:[#allocation2 + $0x248] sm:$0xf]  ;;  %v2905_v17 = vld [vmem:[#allocation2 + $0x254] sm:$0xf0]  ;;  %v2105_v21 = vor.u32 %v2873_v15, %v2104_v13  ;;  %v2298_v5 = vld [vmem:[#allocation2 + $0x2d8] sm:$0xf0] }
  0x59   :  { %1017 = vmatpush.bf16.msra.mxu2 %v2313_v22  ;;  %986 = vmatmul.bf16.vlgmr.msrb.gmra.mxu3 %v3269_v58  ;;  %v2360_v18 = vld [vmem:[#allocation2 + $0x348] sm:$0xf]  ;;  %v2937_v19 = vld [vmem:[#allocation2 + $0x354] sm:$0xf0]  ;;  %v2233_v22 = vor.u32 %v2905_v17, %v2232_v16  ;;  %v2951_v6 = vld [vmem:[#allocation2 + $0x3cc] sm:$0xf] }
  0x5a   :  { %1030 = vmatpush.bf16.msra.mxu3 %v2441_v26  ;;  %v1960_v23 = vld [vmem:[#allocation2 + $0x28] sm:$0xf]  ;;  %v2837_v24 = vld [vmem:[#allocation2 + $0x34] sm:$0xf0]  ;;  %v2361_v26 = vor.u32 %v2937_v19, %v2360_v18  ;;  %v2426_v7 = vld [vmem:[#allocation2 + $0x3d8] sm:$0xf0] }
  0x5b   :  { %992 = vmatpush.bf16.msra.mxu0 %v2041_v32  ;;  %v2088_v25 = vld [vmem:[#allocation2 + $0x128] sm:$0xf]  ;;  %v2869_v27 = vld [vmem:[#allocation2 + $0x134] sm:$0xf0]  ;;  %v1961_v32 = vor.u32 %v2837_v24, %v1960_v23  ;;  %v2851_v11 = vld [vmem:[#allocation2 + $0xac] sm:$0xf] }
  0x5c   :  { %1005 = vmatpush.bf16.msra.mxu1 %v2169_v33  ;;  %v2216_v28 = vld [vmem:[#allocation2 + $0x228] sm:$0xf]  ;;  %v2901_v29 = vld [vmem:[#allocation2 + $0x234] sm:$0xf0]  ;;  %v2089_v35 = vor.u32 %v2869_v27, %v2088_v25  ;;  %v2026_v12 = vld [vmem:[#allocation2 + $0xb8] sm:$0xf0] }
  0x5d   :  { %1018 = vmatpush.bf16.msra.mxu2 %v2297_v34  ;;  %v2344_v30 = vld [vmem:[#allocation2 + $0x328] sm:$0xf]  ;;  %v2933_v31 = vld [vmem:[#allocation2 + $0x334] sm:$0xf0]  ;;  %v2217_v36 = vor.u32 %v2901_v29, %v2216_v28  ;;  %v2883_v13 = vld [vmem:[#allocation2 + $0x1ac] sm:$0xf] }
  0x5e   :  { %1031 = vmatpush.bf16.msra.mxu3 %v2425_v38  ;;  %v1944_v33 = vld [vmem:[#allocation2 + $0x8] sm:$0xf]  ;;  %v2833_v34 = vld [vmem:[#allocation2 + $0x14] sm:$0xf0]  ;;  %v2345_v40 = vor.u32 %v2933_v31, %v2344_v30  ;;  %v2154_v15 = vld [vmem:[#allocation2 + $0x1b8] sm:$0xf0] }
  0x5f   :  { %993 = vmatpush.bf16.msra.mxu0 %v2025_v44  ;;  %v2072_v37 = vld [vmem:[#allocation2 + $0x108] sm:$0xf]  ;;  %v2865_v38 = vld [vmem:[#allocation2 + $0x114] sm:$0xf0]  ;;  %v2859_v44 = vld [vmem:[#allocation2 + $0xec] sm:$0xf]  ;;  %v1945_v47 = vor.u32 %v2833_v34, %v1944_v33 }
  0x60   :  { %1006 = vmatpush.bf16.msra.mxu1 %v2153_v45  ;;  %v2200_v39 = vld [vmem:[#allocation2 + $0x208] sm:$0xf]  ;;  %v2897_v41 = vld [vmem:[#allocation2 + $0x214] sm:$0xf0]  ;;  %v2058_v45 = vld [vmem:[#allocation2 + $0xf8] sm:$0xf0]  ;;  %v2073_v51 = vor.u32 %v2865_v38, %v2072_v37 }
  0x61   :  { %1019 = vmatpush.bf16.msra.mxu2 %v2281_v46  ;;  %v2328_v42 = vld [vmem:[#allocation2 + $0x308] sm:$0xf]  ;;  %v2929_v43 = vld [vmem:[#allocation2 + $0x314] sm:$0xf0]  ;;  %v2891_v46 = vld [vmem:[#allocation2 + $0x1ec] sm:$0xf]  ;;  %v2201_v52 = vor.u32 %v2897_v41, %v2200_v39 }
  0x62   :  { %1032 = vmatpush.bf16.msra.mxu3 %v2409_v50  ;;  %v2314_v50 = vld [vmem:[#allocation2 + $0x2f8] sm:$0xf0]  ;;  %v2329_v56 = vor.u32 %v2929_v43, %v2328_v42  ;;  %v2915_v16 = vld [vmem:[#allocation2 + $0x2ac] sm:$0xf] }
  0x63   :  { %994 = vmatpush.bf16.msra.mxu0 %v2009_v59  ;;  %v2061_v59 = vor.u32 %v2859_v44, %v2058_v45  ;;  %v2282_v17 = vld [vmem:[#allocation2 + $0x2b8] sm:$0xf0]  ;;  %v2947_v18 = vld [vmem:[#allocation2 + $0x3ac] sm:$0xf] }
  0x64   :  { %1007 = vmatpush.bf16.msra.mxu1 %v2137_v61  ;;  %v2189_v61 = vor.u32 %v2891_v46, %v2186_v48  ;;  %v2410_v19 = vld [vmem:[#allocation2 + $0x3b8] sm:$0xf0]  ;;  %v2847_v23 = vld [vmem:[#allocation2 + $0x8c] sm:$0xf] }
  0x65   :  { %1020 = vmatpush.bf16.msra.mxu2 %v2265_v62  ;;  %v2317_v62 = vor.u32 %v2923_v49, %v2314_v50  ;;  %v2010_v24 = vld [vmem:[#allocation2 + $0x98] sm:$0xf0]  ;;  %v2879_v25 = vld [vmem:[#allocation2 + $0x18c] sm:$0xf] }
  0x66   :  { %1033 = vmatpush.bf16.msra.mxu3 %v2393_v2  ;;  %v2445_v2 = vor.u32 %v2955_v53, %v2442_v55  ;;  %v2138_v27 = vld [vmem:[#allocation2 + $0x198] sm:$0xf0]  ;;  %v2911_v28 = vld [vmem:[#allocation2 + $0x28c] sm:$0xf] }
  0x67   :  { %995 = vmatpush.bf16.msra.mxu0 %v1993_v8  ;;  %v2045_v8 = vor.u32 %v2855_v63, %v2042_v0  ;;  %v2266_v29 = vld [vmem:[#allocation2 + $0x298] sm:$0xf0]  ;;  %v2943_v30 = vld [vmem:[#allocation2 + $0x38c] sm:$0xf]  ;;  %v2141_v33 = vor.u32 %v2879_v25, %v2138_v27 }
  0x68   :  { %1008 = vmatpush.bf16.msra.mxu1 %v2121_v9  ;;  %v2173_v9 = vor.u32 %v2887_v1, %v2170_v3  ;;  %v2394_v31 = vld [vmem:[#allocation2 + $0x398] sm:$0xf0]  ;;  %v2269_v34 = vor.u32 %v2911_v28, %v2266_v29  ;;  %v2875_v37 = vld [vmem:[#allocation2 + $0x16c] sm:$0xf]  ;;  %v2496_v29 = vld [vmem:[#allocation4 + $0x60] sm:$0xf] }
  0x69   :  { %1021 = vmatpush.bf16.msra.mxu2 %v2249_v10  ;;  %v2301_v10 = vor.u32 %v2919_v4, %v2298_v5  ;;  %v2397_v38 = vor.u32 %v2943_v30, %v2394_v31  ;;  %v2122_v39 = vld [vmem:[#allocation2 + $0x178] sm:$0xf0]  ;;  %v2939_v42 = vld [vmem:[#allocation2 + $0x36c] sm:$0xf]  ;;  %v2971_v30 = vld [vmem:[#allocation4 + $0x64] sm:$0xf0] }
  0x6a   :  { %1034 = vmatpush.bf16.msra.mxu3 %v2377_v14  ;;  %v2429_v14 = vor.u32 %v2951_v6, %v2426_v7  ;;  %v2250_v41 = vld [vmem:[#allocation2 + $0x278] sm:$0xf0]  ;;  %v2125_v45 = vor.u32 %v2875_v37, %v2122_v39  ;;  %v2871_v49 = vld [vmem:[#allocation2 + $0x14c] sm:$0xf]  ;;  %v2480_v39 = vld [vmem:[#allocation4 + $0x40] sm:$0xf] }
  0x6b   :  { %996 = vmatpush.bf16.msra.mxu0 %v1977_v20  ;;  %v2029_v20 = vor.u32 %v2851_v11, %v2026_v12  ;;  %v2378_v43 = vld [vmem:[#allocation2 + $0x378] sm:$0xf0]  ;;  %v2935_v55 = vld [vmem:[#allocation2 + $0x34c] sm:$0xf] }
  0x6c   :  { %1009 = vmatpush.bf16.msra.mxu1 %v2105_v21  ;;  %v2157_v21 = vor.u32 %v2883_v13, %v2154_v15  ;;  %v1978_v48 = vld [vmem:[#allocation2 + $0x58] sm:$0xf0]  ;;  %v2381_v50 = vor.u32 %v2939_v42, %v2378_v43  ;;  %v2835_v63 = vld [vmem:[#allocation2 + $0x2c] sm:$0xf]  ;;  %v2472_v42 = vld [vmem:[#allocation4 + $0x30] sm:$0xf] }
  0x6d   :  { %1022 = vmatpush.bf16.msra.mxu2 %v2233_v22  ;;  %v2285_v22 = vor.u32 %v2915_v16, %v2282_v17  ;;  %v2234_v53 = vld [vmem:[#allocation2 + $0x258] sm:$0xf0]  ;;  %v2867_v1 = vld [vmem:[#allocation2 + $0x12c] sm:$0xf]  ;;  %v2965_v43 = vld [vmem:[#allocation4 + $0x34] sm:$0xf0] }
  0x6e   :  { %1035 = vmatpush.bf16.msra.mxu3 %v2361_v26  ;;  %v2413_v26 = vor.u32 %v2947_v18, %v2410_v19  ;;  %v1962_v0 = vld [vmem:[#allocation2 + $0x38] sm:$0xf0]  ;;  %v2899_v4 = vld [vmem:[#allocation2 + $0x22c] sm:$0xf] }
  0x6f   :  { %997 = vmatpush.bf16.msra.mxu0 %v1961_v32  ;;  %v2013_v32 = vor.u32 %v2847_v23, %v2010_v24  ;;  %v2090_v3 = vld [vmem:[#allocation2 + $0x138] sm:$0xf0]  ;;  %v2931_v6 = vld [vmem:[#allocation2 + $0x32c] sm:$0xf]  ;;  %v2568_v23 = vld [vmem:[#allocation4 + $0xf0] sm:$0xf] }
  0x70   :  { %1010 = vmatpush.bf16.msra.mxu1 %v2089_v35  ;;  %v2843_v35 = vld [vmem:[#allocation2 + $0x6c] sm:$0xf]  ;;  %v2218_v5 = vld [vmem:[#allocation2 + $0x238] sm:$0xf0]  ;;  %v2989_v24 = vld [vmem:[#allocation4 + $0xf4] sm:$0xf0] }
  0x71   :  { %1023 = vmatpush.bf16.msra.mxu2 %v2217_v36  ;;  %v1994_v36 = vld [vmem:[#allocation2 + $0x78] sm:$0xf0]  ;;  %v2221_v11 = vor.u32 %v2899_v4, %v2218_v5  ;;  %v2863_v13 = vld [vmem:[#allocation2 + $0x10c] sm:$0xf]  ;;  %v2569_v31 = vor.u32 %v2989_v24, %v2568_v23  ;;  %v3005_v4 = vld [vmem:[#allocation4 + $0x174] sm:$0xf0] }
  0x72   :  { %1036 = vmatpush.bf16.msra.mxu3 %v2345_v40  ;;  %v2907_v40 = vld [vmem:[#allocation2 + $0x26c] sm:$0xf]  ;;  %v1997_v44 = vor.u32 %v2843_v35, %v1994_v36  ;;  %v2346_v7 = vld [vmem:[#allocation2 + $0x338] sm:$0xf0]  ;;  %v2488_v35 = vld [vmem:[#allocation4 + $0x50] sm:$0xf] }
  0x73   :  { %998 = vmatpush.bf16.msra.mxu0 %v1945_v47  ;;  %v2253_v46 = vor.u32 %v2907_v40, %v2250_v41  ;;  %v2839_v47 = vld [vmem:[#allocation2 + $0x4c] sm:$0xf]  ;;  %v1946_v12 = vld [vmem:[#allocation2 + $0x18] sm:$0xf0]  ;;  %v2349_v15 = vor.u32 %v2931_v6, %v2346_v7  ;;  %v2969_v36 = vld [vmem:[#allocation4 + $0x54] sm:$0xf0] }
  0x74   :  { %1011 = vmatpush.bf16.msra.mxu1 %v2073_v51  ;;  %v2106_v51 = vld [vmem:[#allocation2 + $0x158] sm:$0xf0]  ;;  %v2895_v16 = vld [vmem:[#allocation2 + $0x20c] sm:$0xf]  ;;  %v2967_v40 = vld [vmem:[#allocation4 + $0x44] sm:$0xf0] }
  0x75   :  { %1024 = vmatpush.bf16.msra.mxu2 %v2201_v52  ;;  %v2903_v52 = vld [vmem:[#allocation2 + $0x24c] sm:$0xf]  ;;  %v2202_v17 = vld [vmem:[#allocation2 + $0x218] sm:$0xf0]  ;;  %v2481_v41 = vor.u32 %v2967_v40, %v2480_v39  ;;  %v2970_v6 = vld [vmem:[#allocation4 + $0x64] sm:$0xf] }
  0x76   :  { %1037 = vmatpush.bf16.msra.mxu3 %v2329_v56  ;;  %999 = vmatmul.bf16.vlgmr.msra.gmra.mxu0 %v3267_v57  ;;  %v2362_v56 = vld [vmem:[#allocation2 + $0x358] sm:$0xf0]  ;;  %v2927_v18 = vld [vmem:[#allocation2 + $0x30c] sm:$0xf]  ;;  %v2966_v23 = vld [vmem:[#allocation4 + $0x44] sm:$0xf] }
  0x77   :  { %1043 = vmatpush.bf16.msrb.mxu0 %v2061_v59  ;;  %1012 = vmatmul.bf16.vlgmr.msra.gmra.mxu1 %v3271_v60  ;;  %v1981_v59 = vor.u32 %v2839_v47, %v1978_v48  ;;  %v2330_v19 = vld [vmem:[#allocation2 + $0x318] sm:$0xf0]  ;;  %v2464_v47 = vld [vmem:[#allocation4 + $0x20] sm:$0xf]  ;;  %v2961_v48 = vld [vmem:[#allocation4 + $0x14] sm:$0xf0] }
  0x78   :  { %1056 = vmatpush.bf16.msrb.mxu1 %v2189_v61  ;;  %1025 = vmatmul.bf16.vlgmr.msra.gmra.mxu2 %v3265_v54  ;;  %v2109_v61 = vor.u32 %v2871_v49, %v2106_v51  ;;  %v2333_v27 = vor.u32 %v2927_v18, %v2330_v19  ;;  %v2544_v49 = vld [vmem:[#allocation4 + $0xc0] sm:$0xf]  ;;  %v2988_v18 = vld [vmem:[#allocation4 + $0xf4] sm:$0xf]  ;;  %v2570_v19 = vld [vmem:[#allocation4 + $0xf8] sm:$0xf0] }
  0x79   :  { %1069 = vmatpush.bf16.msrb.mxu2 %v2317_v62  ;;  %1038 = vmatmul.bf16.vlgmr.msra.gmra.mxu3 %v3269_v58  ;;  %v2237_v62 = vor.u32 %v2903_v52, %v2234_v53  ;;  %v2536_v52 = vld [vmem:[#allocation4 + $0xb0] sm:$0xf]  ;;  %v2981_v53 = vld [vmem:[#allocation4 + $0xb4] sm:$0xf0]  ;;  %v2482_v24 = vld [vmem:[#allocation4 + $0x48] sm:$0xf0] }
  0x7a   :  { %1082 = vmatpush.bf16.msrb.mxu3 %v2445_v2  ;;  %v2365_v2 = vor.u32 %v2935_v55, %v2362_v56  ;;  %v2448_v56 = vld [vmem:[#allocation4] sm:$0xf] }
  0x7b   :  { %1044 = vmatpush.bf16.msrb.mxu0 %v2045_v8  ;;  %v1965_v8 = vor.u32 %v2835_v63, %v1962_v0  ;;  %v2506_v63 = vld [vmem:[#allocation4 + $0x78] sm:$0xf0]  ;;  %v2528_v0 = vld [vmem:[#allocation4 + $0xa0] sm:$0xf] }
  0x7c   :  { %1057 = vmatpush.bf16.msrb.mxu1 %v2173_v9  ;;  %v2831_v9 = vld [vmem:[#allocation2 + $0xc] sm:$0xf] }
  0x7d   :  { %1070 = vmatpush.bf16.msrb.mxu2 %v2301_v10  ;;  %v2093_v10 = vor.u32 %v2867_v1, %v2090_v3  ;;  %v2979_v1 = vld [vmem:[#allocation4 + $0xa4] sm:$0xf0]  ;;  %v2632_v3 = vld [vmem:[#allocation4 + $0x170] sm:$0xf] }
  0x7e   :  { %1083 = vmatpush.bf16.msrb.mxu3 %v2429_v14  ;;  %v2074_v14 = vld [vmem:[#allocation2 + $0x118] sm:$0xf0]  ;;  %v2529_v7 = vor.u32 %v2979_v1, %v2528_v0  ;;  %v2958_v1 = vld [vmem:[#allocation4 + $0x4] sm:$0xf] }
  0x7f   :  { %1045 = vmatpush.bf16.msrb.mxu0 %v2029_v20  ;;  %v2504_v20 = vld [vmem:[#allocation4 + $0x70] sm:$0xf]  ;;  %v2077_v25 = vor.u32 %v2863_v13, %v2074_v14  ;;  %v2968_v13 = vld [vmem:[#allocation4 + $0x54] sm:$0xf] }
  0x80   :  { %1058 = vmatpush.bf16.msrb.mxu1 %v2157_v21  ;;  %v2973_v21 = vld [vmem:[#allocation4 + $0x74] sm:$0xf0] }
  0x81   :  { %1071 = vmatpush.bf16.msrb.mxu2 %v2285_v22  ;;  %v1949_v22 = vor.u32 %v2831_v9, %v1946_v12  ;;  %v2505_v28 = vor.u32 %v2973_v21, %v2504_v20  ;;  %v2498_v9 = vld [vmem:[#allocation4 + $0x68] sm:$0xf0]  ;;  %v3292_v20 = vld [vmem:[%s3363_s2] sm:$0xf] }
  0x82   :  { %1084 = vmatpush.bf16.msrb.mxu3 %v2413_v26  ;;  %v2205_v26 = vor.u32 %v2895_v16, %v2202_v17  ;;  %v2501_v12 = vor.u32 %v2970_v6, %v2498_v9  ;;  %v2512_v16 = vld [vmem:[#allocation4 + $0x80] sm:$0xf]  ;;  %v2975_v17 = vld [vmem:[#allocation4 + $0x84] sm:$0xf0]  ;;  %v2997_v6 = vld [vmem:[#allocation4 + $0x134] sm:$0xf0] }
  0x83   :  { %1046 = vmatpush.bf16.msrb.mxu0 %v2013_v32  ;;  %v2560_v32 = vld [vmem:[#allocation4 + $0xe0] sm:$0xf] }
  0x84   :  { %1059 = vmatpush.bf16.msrb.mxu1 %v2141_v33  ;;  %v2987_v33 = vld [vmem:[#allocation4 + $0xe4] sm:$0xf0] }
  0x85   :  { %1072 = vmatpush.bf16.msrb.mxu2 %v2269_v34  ;;  %v2497_v34 = vor.u32 %v2971_v30, %v2496_v29  ;;  %v2561_v37 = vor.u32 %v2987_v33, %v2560_v32  ;;  %v2964_v29 = vld [vmem:[#allocation4 + $0x34] sm:$0xf]  ;;  %v2474_v30 = vld [vmem:[#allocation4 + $0x38] sm:$0xf0]  ;;  %v2624_v33 = vld [vmem:[#allocation4 + $0x160] sm:$0xf] }
  0x86   :  { %1085 = vmatpush.bf16.msrb.mxu3 %v2397_v38  ;;  %v2489_v38 = vor.u32 %v2969_v36, %v2488_v35  ;;  %v2986_v35 = vld [vmem:[#allocation4 + $0xe4] sm:$0xf]  ;;  %v2477_v39 = vor.u32 %v2964_v29, %v2474_v30  ;;  %v2576_v30 = vld [vmem:[#allocation4 + $0x100] sm:$0xf] }
  0x87   :  { %1047 = vmatpush.bf16.msrb.mxu0 %v1997_v44  ;;  %v2985_v44 = vld [vmem:[#allocation4 + $0xd4] sm:$0xf0] }
  0x88   :  { %1060 = vmatpush.bf16.msrb.mxu1 %v2125_v45 }
  0x89   :  { %1073 = vmatpush.bf16.msrb.mxu2 %v2253_v46  ;;  %v2473_v46 = vor.u32 %v2965_v43, %v2472_v42  ;;  %v2466_v42 = vld [vmem:[#allocation4 + $0x28] sm:$0xf0] }
  0x8a   :  { %1086 = vmatpush.bf16.msrb.mxu3 %v2381_v50  ;;  %v2983_v50 = vld [vmem:[#allocation4 + $0xc4] sm:$0xf0] }
  0x8b   :  { %1048 = vmatpush.bf16.msrb.mxu0 %v1981_v59  ;;  %v2545_v51 = vor.u32 %v2983_v50, %v2544_v49  ;;  %v2959_v59 = vld [vmem:[#allocation4 + $0x4] sm:$0xf0] }
  0x8c   :  { %1061 = vmatpush.bf16.msrb.mxu1 %v2109_v61  ;;  %v2972_v61 = vld [vmem:[#allocation4 + $0x74] sm:$0xf] }
  0x8d   :  { %1074 = vmatpush.bf16.msrb.mxu2 %v2237_v62  ;;  %v2537_v62 = vor.u32 %v2981_v53, %v2536_v52  ;;  %v2509_v5 = vor.u32 %v2972_v61, %v2506_v63  ;;  %v2458_v52 = vld [vmem:[#allocation4 + $0x18] sm:$0xf0]  ;;  %v2546_v63 = vld [vmem:[#allocation4 + $0xc8] sm:$0xf0] }
  0x8e   :  { %1087 = vmatpush.bf16.msrb.mxu3 %v2365_v2  ;;  %v2449_v2 = vor.u32 %v2959_v59, %v2448_v56  ;;  %v2999_v56 = vld [vmem:[#allocation4 + $0x144] sm:$0xf0]  ;;  %v2982_v59 = vld [vmem:[#allocation4 + $0xc4] sm:$0xf] }
  0x8f   :  { %1049 = vmatpush.bf16.msrb.mxu0 %v1965_v8  ;;  %v2633_v8 = vor.u32 %v3005_v4, %v2632_v3  ;;  %v2549_v3 = vor.u32 %v2982_v59, %v2546_v63  ;;  %v2998_v63 = vld [vmem:[#allocation4 + $0x144] sm:$0xf] }
  0x90   :  { %1062 = vmatpush.bf16.msrb.mxu1 %v2093_v10  ;;  %v2520_v10 = vld [vmem:[#allocation4 + $0x90] sm:$0xf] }
  0x91   :  { %1075 = vmatpush.bf16.msrb.mxu2 %v2221_v11  ;;  %v2977_v11 = vld [vmem:[#allocation4 + $0x94] sm:$0xf0] }
  0x92   :  { %1088 = vmatpush.bf16.msrb.mxu3 %v2349_v15  ;;  %v2521_v14 = vor.u32 %v2977_v11, %v2520_v10  ;;  %v2490_v15 = vld [vmem:[#allocation4 + $0x58] sm:$0xf0]  ;;  %v2592_v11 = vld [vmem:[#allocation4 + $0x120] sm:$0xf] }
  0x93   :  { %1050 = vmatpush.bf16.msrb.mxu0 %v1949_v22  ;;  %v2493_v21 = vor.u32 %v2968_v13, %v2490_v15  ;;  %v2513_v22 = vor.u32 %v2975_v17, %v2512_v16  ;;  %v2538_v10 = vld [vmem:[#allocation4 + $0xb8] sm:$0xf0]  ;;  %v2978_v15 = vld [vmem:[#allocation4 + $0xa4] sm:$0xf]  ;;  %v2530_v16 = vld [vmem:[#allocation4 + $0xa8] sm:$0xf0] }
  0x94   :  { %1063 = vmatpush.bf16.msrb.mxu1 %v2077_v25  ;;  %v2573_v25 = vor.u32 %v2988_v18, %v2570_v19  ;;  %v2584_v19 = vld [vmem:[#allocation4 + $0x110] sm:$0xf] }
  0x95   :  { %1076 = vmatpush.bf16.msrb.mxu2 %v2205_v26  ;;  %v239_v26 = vperm.slane %v3292_v20, 0 }
  0x96   :  { %1089 = vmatpush.bf16.msrb.mxu3 %v2333_v27  ;;  %1051 = vmatmul.bf16.vlgmr.msrb.gmra.mxu0 %v3267_v57  ;;  %v2552_v57 = vld [vmem:[#allocation4 + $0xd0] sm:$0xf]  ;;  %v2485_v27 = vor.u32 %v2966_v23, %v2482_v24  ;;  %v3021_v24 = vld [vmem:[#allocation4 + $0x1f4] sm:$0xf0] }
  0x97   :  { %1493 = vmatpush.bf16.msra.mxu0 %v2505_v28  ;;  %1064 = vmatmul.bf16.vlgmr.msrb.gmra.mxu1 %v3271_v60  ;;  %v2553_v45 = vor.u32 %v2985_v44, %v2552_v57  ;;  %v2963_v60 = vld [vmem:[#allocation4 + $0x24] sm:$0xf0]  ;;  %v2616_v57 = vld [vmem:[#allocation4 + $0x150] sm:$0xf]  ;;  %v3001_v44 = vld [vmem:[#allocation4 + $0x154] sm:$0xf0] }
  0x98   :  { %1506 = vmatpush.bf16.msra.mxu1 %v2569_v31  ;;  %1077 = vmatmul.bf16.vlgmr.msrb.gmra.mxu2 %v3265_v54  ;;  %v2465_v54 = vor.u32 %v2963_v60, %v2464_v47  ;;  %v2617_v60 = vor.u32 %v3001_v44, %v2616_v57  ;;  %v2696_v23 = vld [vmem:[#allocation4 + $0x1f0] sm:$0xf] }
  0x99   :  { %1090 = vmatmul.bf16.vlgmr.msrb.gmra.mxu3 %v3269_v58  ;;  %v2456_v58 = vld [vmem:[#allocation4 + $0x10] sm:$0xf]  ;;  %1519 = vmatpush.bf16.msra.mxu2 %v2633_v8 }
  0x9a   :  { %v2457_v55 = vor.u32 %v2961_v48, %v2456_v58 }
  0x9b   :  { %1494 = vmatpush.bf16.msra.mxu0 %v2497_v34  ;;  %v3003_v34 = vld [vmem:[#allocation4 + $0x164] sm:$0xf0] }
  0x9c   :  { %1507 = vmatpush.bf16.msra.mxu1 %v2561_v37  ;;  %v2625_v36 = vor.u32 %v3003_v34, %v2624_v33  ;;  %v2562_v37 = vld [vmem:[#allocation4 + $0xe8] sm:$0xf0]  ;;  %v3004_v34 = vld [vmem:[#allocation4 + $0x174] sm:$0xf] }
  0x9d   :  { %v2565_v40 = vor.u32 %v2986_v35, %v2562_v37  ;;  %v2514_v33 = vld [vmem:[#allocation4 + $0x88] sm:$0xf0]  ;;  %v2634_v35 = vld [vmem:[#allocation4 + $0x178] sm:$0xf0] }
  0x9e   :  { %1520 = vmatpush.bf16.msra.mxu2 %v2625_v36 }
  0x9f   :  { %1495 = vmatpush.bf16.msra.mxu0 %v2489_v38 }
  0xa0   :  { %1508 = vmatpush.bf16.msra.mxu1 %v2553_v45  ;;  %v2984_v45 = vld [vmem:[#allocation4 + $0xd4] sm:$0xf] }
  0xa2   :  { %1521 = vmatpush.bf16.msra.mxu2 %v2617_v60 }
  0xa3   :  { %1496 = vmatpush.bf16.msra.mxu0 %v2481_v41  ;;  %v2962_v41 = vld [vmem:[#allocation4 + $0x24] sm:$0xf] }
  0xa4   :  { %1509 = vmatpush.bf16.msra.mxu1 %v2545_v51  ;;  %v2469_v58 = vor.u32 %v2962_v41, %v2466_v42  ;;  %v2960_v51 = vld [vmem:[#allocation4 + $0x14] sm:$0xf]  ;;  %v2688_v41 = vld [vmem:[#allocation4 + $0x1e0] sm:$0xf]  ;;  %v3019_v42 = vld [vmem:[#allocation4 + $0x1e4] sm:$0xf0] }
  0xa5   :  { %v2461_v0 = vor.u32 %v2960_v51, %v2458_v52  ;;  %v2618_v51 = vld [vmem:[#allocation4 + $0x158] sm:$0xf0] }
  0xa7   :  { %1497 = vmatpush.bf16.msra.mxu0 %v2473_v46 }
  0xa8   :  { %1510 = vmatpush.bf16.msra.mxu1 %v2537_v62 }
  0xab   :  { %1498 = vmatpush.bf16.msra.mxu0 %v2465_v54  ;;  %v2554_v54 = vld [vmem:[#allocation4 + $0xd8] sm:$0xf0] }
  0xac   :  { %1511 = vmatpush.bf16.msra.mxu1 %v2529_v7  ;;  %v2557_v48 = vor.u32 %v2984_v45, %v2554_v54  ;;  %v2980_v7 = vld [vmem:[#allocation4 + $0xb4] sm:$0xf]  ;;  %v2689_v45 = vor.u32 %v3019_v42, %v2688_v41  ;;  %v2680_v54 = vld [vmem:[#allocation4 + $0x1d0] sm:$0xf] }
  0xaf   :  { %1499 = vmatpush.bf16.msra.mxu0 %v2457_v55  ;;  %v2608_v55 = vld [vmem:[#allocation4 + $0x140] sm:$0xf] }
  0xb0   :  { %1512 = vmatpush.bf16.msra.mxu1 %v2521_v14  ;;  %v2609_v62 = vor.u32 %v2999_v56, %v2608_v55  ;;  %v2541_v14 = vor.u32 %v2980_v7, %v2538_v10  ;;  %v3013_v7 = vld [vmem:[#allocation4 + $0x1b4] sm:$0xf0] }
  0xb2   :  { %1522 = vmatpush.bf16.msra.mxu2 %v2609_v62  ;;  %v3015_v62 = vld [vmem:[#allocation4 + $0x1c4] sm:$0xf0] }
  0xb3   :  { %1500 = vmatpush.bf16.msra.mxu0 %v2449_v2  ;;  %v2450_v2 = vld [vmem:[#allocation4 + $0x8] sm:$0xf0] }
  0xb4   :  { %1513 = vmatpush.bf16.msra.mxu1 %v2513_v22  ;;  %v909_v32 = vpop.f32.mrf.mxu1  ;;  %v2453_v17 = vor.u32 %v2958_v1, %v2450_v2  ;;  %v2993_v22 = vld [vmem:[#allocation4 + $0x114] sm:$0xf0]  ;;  %v2610_v2 = vld [vmem:[#allocation4 + $0x148] sm:$0xf0] }
  0xb6   :  { %v896_v28 = vpop.f32.mrf.mxu0 }
  0xb7   :  { %1545 = vmatpush.bf16.msrb.mxu0 %v2509_v5  ;;  %v897_v31 = vadd.f32 %v896_v28, %v239_v26  ;;  %v2600_v5 = vld [vmem:[#allocation4 + $0x130] sm:$0xf]  ;;  %v2522_v26 = vld [vmem:[#allocation4 + $0x98] sm:$0xf0]  ;;  %v2585_v28 = vor.u32 %v2993_v22, %v2584_v19  ;;  %v3009_v22 = vld [vmem:[#allocation4 + $0x194] sm:$0xf0] }
  0xb8   :  { %1558 = vmatpush.bf16.msrb.mxu1 %v2573_v25  ;;  %v2601_v9 = vor.u32 %v2997_v6, %v2600_v5  ;;  %v2976_v25 = vld [vmem:[#allocation4 + $0x94] sm:$0xf]  ;;  %v2664_v6 = vld [vmem:[#allocation4 + $0x1b0] sm:$0xf] }
  0xb9   :  { %v910_v38 = vadd.f32 %v909_v32, %v897_v31  ;;  %v2525_v29 = vor.u32 %v2976_v25, %v2522_v26  ;;  %v2991_v31 = vld [vmem:[#allocation4 + $0x104] sm:$0xf0]  ;;  %v2974_v32 = vld [vmem:[#allocation4 + $0x84] sm:$0xf]  ;;  %v2665_v10 = vor.u32 %v3013_v7, %v2664_v6  ;;  %v2642_v6 = vld [vmem:[#allocation4 + $0x188] sm:$0xf0] }
  0xba   :  { %1523 = vmatpush.bf16.msra.mxu2 %v2601_v9  ;;  %v2577_v36 = vor.u32 %v2991_v31, %v2576_v30  ;;  %v2517_v37 = vor.u32 %v2974_v32, %v2514_v33  ;;  %v2578_v30 = vld [vmem:[#allocation4 + $0x108] sm:$0xf0]  ;;  %v3020_v33 = vld [vmem:[#allocation4 + $0x1f4] sm:$0xf] }
  0xbb   :  { %1546 = vmatpush.bf16.msrb.mxu0 %v2501_v12  ;;  %v922_v43 = vpop.f32.mrf.mxu2  ;;  %v2995_v12 = vld [vmem:[#allocation4 + $0x124] sm:$0xf0] }
  0xbc   :  { %1559 = vmatpush.bf16.msrb.mxu1 %v2565_v40  ;;  %v923_v46 = vadd.f32 %v922_v43, %v910_v38  ;;  %v911_v53 = vpop.f32.mrf.mxu1  ;;  %v2593_v18 = vor.u32 %v2995_v12, %v2592_v11  ;;  %v2637_v38 = vor.u32 %v3004_v34, %v2634_v35  ;;  %v3002_v43 = vld [vmem:[#allocation4 + $0x164] sm:$0xf]  ;;  %v2602_v11 = vld [vmem:[#allocation4 + $0x138] sm:$0xf0]  ;;  %v2656_v12 = vld [vmem:[#allocation4 + $0x1a0] sm:$0xf] }
  0xbd   :  { %v2698_v34 = vld [vmem:[#allocation4 + $0x1f8] sm:$0xf0] }
  0xbe   :  { %v935_v47 = vpop.f32.mrf.mxu3  ;;  %v898_v50 = vpop.f32.mrf.mxu0  ;;  %1524 = vmatpush.bf16.msra.mxu2 %v2593_v18  ;;  %v2701_v35 = vor.u32 %v3020_v33, %v2698_v34  ;;  %v3026_v33 = vld [vmem:[%s3366_s5 + $0x20] sm:$0xff]  ;;  %v3037_v34 = vld [vmem:[%s3366_s5 + $0x78] sm:$0xff] }
  0xbf   :  { %1547 = vmatpush.bf16.msrb.mxu0 %v2493_v21  ;;  %v936_v49 = vadd.f32 %v935_v47, %v923_v46  ;;  %v2533_v21 = vor.u32 %v2978_v15, %v2530_v16  ;;  %v2626_v46 = vld [vmem:[#allocation4 + $0x168] sm:$0xf0]  ;;  %v2994_v16 = vld [vmem:[#allocation4 + $0x124] sm:$0xf] }
  0xc0   :  { %1560 = vmatpush.bf16.msrb.mxu1 %v2557_v48  ;;  %v2629_v47 = vor.u32 %v3002_v43, %v2626_v46  ;;  %v3000_v48 = vld [vmem:[#allocation4 + $0x154] sm:$0xf] }
  0xc1   :  { %v1095_v61 = vmax.f32 %v936_v49, 0.0  ;;  %v2621_v55 = vor.u32 %v3000_v48, %v2618_v51 }
  0xc2   :  { %1525 = vmatpush.bf16.msra.mxu2 %v2585_v28  ;;  %v3007_v28 = vld [vmem:[#allocation4 + $0x184] sm:$0xf0] }
  0xc3   :  { %1548 = vmatpush.bf16.msrb.mxu0 %v2485_v27  ;;  %v1099_v4 = vpack.c.bf16 %v1095_v61, %v1095_v61  ;;  %v924_v8 = vpop.f32.mrf.mxu2  ;;  %v2697_v27 = vor.u32 %v3021_v24, %v2696_v23  ;;  %v2672_v61 = vld [vmem:[#allocation4 + $0x1c0] sm:$0xf]  ;;  %v2992_v23 = vld [vmem:[#allocation4 + $0x114] sm:$0xf]  ;;  %v2586_v24 = vld [vmem:[#allocation4 + $0x118] sm:$0xf0] }
  0xc4   :  { %1561 = vmatpush.bf16.msrb.mxu1 %v2549_v3  ;;  %v2673_v1 = vor.u32 %v3015_v62, %v2672_v61  ;;  %v2996_v8 = vld [vmem:[#allocation4 + $0x134] sm:$0xf]  ;;  %v2589_v26 = vor.u32 %v2992_v23, %v2586_v24  ;;  %v3010_v61 = vld [vmem:[#allocation4 + $0x1a4] sm:$0xf]  ;;  %v2658_v62 = vld [vmem:[#allocation4 + $0x1a8] sm:$0xf0] }
  0xc5   :  { %1501 = vmatmul.bf16.vlgmr.msra.gmra.mxu0 %v1099_v4  ;;  %1532 = vmatpush.bf16.msra.mxu3 %v2697_v27  ;;  %v2605_v15 = vor.u32 %v2996_v8, %v2602_v11  ;;  %v2640_v27 = vld [vmem:[#allocation4 + $0x180] sm:$0xf]  ;;  %v242_v8 = vperm.slane %v3292_v20, 3 }
  0xc6   :  { %v937_v13 = vpop.f32.mrf.mxu3  ;;  %1526 = vmatpush.bf16.msra.mxu2 %v2577_v36  ;;  %v2641_v31 = vor.u32 %v3007_v28, %v2640_v27  ;;  %v241_v36 = vperm.slane %v3292_v20, 2  ;;  %v3029_v28 = vld [vmem:[%s3366_s5 + $0x38] sm:$0xff] }
  0xc7   :  { %1549 = vmatpush.bf16.msrb.mxu0 %v2477_v39  ;;  %v240_v39 = vperm.slane %v3292_v20, 1  ;;  %v3011_v13 = vld [vmem:[#allocation4 + $0x1a4] sm:$0xf0] }
  0xc8   :  { %1562 = vmatpush.bf16.msrb.mxu1 %v2541_v14  ;;  %v2657_v18 = vor.u32 %v3011_v13, %v2656_v12 }
  0xc9   :  { %1533 = vmatpush.bf16.msra.mxu3 %v2689_v45 }
  0xca   :  { %1571 = vmatpush.bf16.msrb.mxu2 %v2637_v38  ;;  %v2690_v38 = vld [vmem:[#allocation4 + $0x1e8] sm:$0xf0] }
  0xcb   :  { %1550 = vmatpush.bf16.msrb.mxu0 %v2469_v58  ;;  %v3017_v58 = vld [vmem:[#allocation4 + $0x1d4] sm:$0xf0] }
  0xcc   :  { %1563 = vmatpush.bf16.msrb.mxu1 %v2533_v21  ;;  %v2681_v50 = vor.u32 %v3017_v58, %v2680_v54  ;;  %v2648_v21 = vld [vmem:[#allocation4 + $0x190] sm:$0xf]  ;;  %v3014_v54 = vld [vmem:[#allocation4 + $0x1c4] sm:$0xf]  ;;  %v2674_v58 = vld [vmem:[#allocation4 + $0x1c8] sm:$0xf0] }
  0xcd   :  { %v2649_v25 = vor.u32 %v3009_v22, %v2648_v21 }
  0xce   :  { %1572 = vmatpush.bf16.msrb.mxu2 %v2629_v47  ;;  %1534 = vmatpush.bf16.msra.mxu3 %v2681_v50  ;;  %v2677_v50 = vor.u32 %v3014_v54, %v2674_v58  ;;  %v3030_v54 = vld [vmem:[%s3366_s5 + $0x40] sm:$0xff] }
  0xcf   :  { %1551 = vmatpush.bf16.msrb.mxu0 %v2461_v0 }
  0xd0   :  { %1564 = vmatpush.bf16.msrb.mxu1 %v2525_v29  ;;  %v2990_v29 = vld [vmem:[#allocation4 + $0x104] sm:$0xf] }
  0xd1   :  { %v2581_v32 = vor.u32 %v2990_v29, %v2578_v30  ;;  %v3028_v30 = vld [vmem:[%s3366_s5 + $0x30] sm:$0xff] }
  0xd2   :  { %1573 = vmatpush.bf16.msrb.mxu2 %v2621_v55  ;;  %1535 = vmatpush.bf16.msra.mxu3 %v2673_v1  ;;  %v2666_v55 = vld [vmem:[#allocation4 + $0x1b8] sm:$0xf0]  ;;  %v2661_v1 = vor.u32 %v3010_v61, %v2658_v62 }
  0xd3   :  { %1552 = vmatpush.bf16.msrb.mxu0 %v2453_v17  ;;  %v948_v40 = vpop.f32.mrf.mxu0  ;;  %v2594_v17 = vld [vmem:[#allocation4 + $0x128] sm:$0xf0] }
  0xd4   :  { %1565 = vmatpush.bf16.msrb.mxu1 %v2517_v37  ;;  %v949_v57 = vadd.f32 %v948_v40, %v240_v39  ;;  %v961_v44 = vpop.f32.mrf.mxu1  ;;  %v2597_v19 = vor.u32 %v2994_v16, %v2594_v17  ;;  %v3018_v37 = vld [vmem:[#allocation4 + $0x1e4] sm:$0xf] }
  0xd5   :  { %v2693_v40 = vor.u32 %v3018_v37, %v2690_v38  ;;  %v3024_v37 = vld [vmem:[%s3366_s5 + $0x10] sm:$0xff] }
  0xd6   :  { %1553 = vmatmul.bf16.vlgmr.msrb.gmra.mxu0 %v1099_v4  ;;  %v962_v60 = vadd.f32 %v961_v44, %v949_v57  ;;  %v2613_v4 = vor.u32 %v2998_v63, %v2610_v2  ;;  %1536 = vmatpush.bf16.msra.mxu3 %v2665_v10  ;;  %v3016_v57 = vld [vmem:[#allocation4 + $0x1d4] sm:$0xf]  ;;  %v2682_v44 = vld [vmem:[#allocation4 + $0x1d8] sm:$0xf0] }
  0xd7   :  { %v2685_v45 = vor.u32 %v3016_v57, %v2682_v44  ;;  %v3008_v2 = vld [vmem:[#allocation4 + $0x194] sm:$0xf]  ;;  %1733 = vmatpush.bf16.msra.mxu0 %v3029_v28  ;;  %v3033_v57 = vld [vmem:[%s3366_s5 + $0x58] sm:$0xff] }
  0xd8   :  { %1574 = vmatpush.bf16.msrb.mxu2 %v2613_v4  ;;  %v3036_v38 = vld [vmem:[%s3366_s5 + $0x70] sm:$0xff] }
  0xd9   :  { %v3032_v44 = vld [vmem:[%s3366_s5 + $0x50] sm:$0xff] }
  0xda   :  { %1537 = vmatpush.bf16.msra.mxu3 %v2657_v18  ;;  %v3048_v28 = vld [vmem:[#allocation7 + $0x10] sm:$0xff] }
  0xdb   :  { %v974_v49 = vpop.f32.mrf.mxu2  ;;  %v950_v59 = vpop.f32.mrf.mxu0  ;;  %1734 = vmatpush.bf16.msra.mxu0 %v3028_v30  ;;  %v3046_v30 = vld [vmem:[#allocation7] sm:$0xff] }
  0xdc   :  { %v975_v52 = vadd.f32 %v974_v49, %v962_v60  ;;  %v987_v53 = vpop.f32.mrf.mxu3  ;;  %v963_v0 = vpop.f32.mrf.mxu1  ;;  %1575 = vmatpush.bf16.msrb.mxu2 %v2605_v15 }
  0xde   :  { %v988_v56 = vadd.f32 %v987_v53, %v975_v52  ;;  %1538 = vmatpush.bf16.msra.mxu3 %v2649_v25  ;;  %v3012_v53 = vld [vmem:[#allocation4 + $0x1b4] sm:$0xf] }
  0xdf   :  { %v2669_v59 = vor.u32 %v3012_v53, %v2666_v55 }
  0xe0   :  { %v1096_v3 = vmax.f32 %v988_v56, 0.0  ;;  %1576 = vmatpush.bf16.msrb.mxu2 %v2597_v19 }
  0xe2   :  { %v1100_v5 = vpack.c.bf16 %v1096_v3, %v1096_v3  ;;  %1539 = vmatpush.bf16.msra.mxu3 %v2641_v31  ;;  %v2650_v3 = vld [vmem:[#allocation4 + $0x198] sm:$0xf0]  ;;  %v3027_v31 = vld [vmem:[%s3366_s5 + $0x28] sm:$0xff] }
  0xe3   :  { %v976_v9 = vpop.f32.mrf.mxu2  ;;  %v2653_v4 = vor.u32 %v3008_v2, %v2650_v3  ;;  %1735 = vmatpush.bf16.msra.mxu0 %v3027_v31  ;;  %v3065_v31 = vld [vmem:[%s3369_s8] ss:$0 sm:$0xff] }
  0xe4   :  { %1514 = vmatmul.bf16.vlgmr.msra.gmra.mxu1 %v1100_v5  ;;  %v989_v14 = vpop.f32.mrf.mxu3  ;;  %1577 = vmatpush.bf16.msrb.mxu2 %v2589_v26 }
  0xe5   :  { %1746 = vmatpush.bf16.msra.mxu1 %v3037_v34 }
  0xe6   :  { %1584 = vmatpush.bf16.msrb.mxu3 %v2701_v35  ;;  %v3025_v35 = vld [vmem:[%s3366_s5 + $0x18] sm:$0xff] }
  0xe7   :  { %1736 = vmatpush.bf16.msra.mxu0 %v3026_v33 }
  0xe8   :  { %1578 = vmatpush.bf16.msrb.mxu2 %v2581_v32 }
  0xe9   :  { %1747 = vmatpush.bf16.msra.mxu1 %v3036_v38 }
  0xea   :  { %1585 = vmatpush.bf16.msrb.mxu3 %v2693_v40  ;;  %v3035_v40 = vld [vmem:[%s3366_s5 + $0x68] sm:$0xff] }
  0xeb   :  { %1737 = vmatpush.bf16.msra.mxu0 %v3025_v35 }
  0xed   :  { %1748 = vmatpush.bf16.msra.mxu1 %v3035_v40 }
  0xee   :  { %1586 = vmatpush.bf16.msrb.mxu3 %v2685_v45 }
  0xef   :  { %1738 = vmatpush.bf16.msra.mxu0 %v3024_v37  ;;  %v3066_v37 = vld [vmem:[%s3371_s10] ss:$0 sm:$0xff] }
  0xf2   :  { %1587 = vmatpush.bf16.msrb.mxu3 %v2677_v50 }
  0xf3   :  { %v1000_v39 = vpop.f32.mrf.mxu0 }
  0xf4   :  { %1566 = vmatmul.bf16.vlgmr.msrb.gmra.mxu1 %v1100_v5  ;;  %v1001_v41 = vadd.f32 %v1000_v39, %v241_v36  ;;  %v1013_v42 = vpop.f32.mrf.mxu1  ;;  %v3006_v5 = vld [vmem:[#allocation4 + $0x184] sm:$0xf]  ;;  %v3023_v39 = vld [vmem:[%s3366_s5 + $0x8] sm:$0xff] }
  0xf5   :  { %v2645_v7 = vor.u32 %v3006_v5, %v2642_v6  ;;  %1739 = vmatpush.bf16.msra.mxu0 %v3023_v39 }
  0xf6   :  { %v1014_v43 = vadd.f32 %v1013_v42, %v1001_v41  ;;  %1588 = vmatpush.bf16.msrb.mxu3 %v2669_v59  ;;  %v3022_v42 = vld [vmem:[%s3366_s5] sm:$0xff] }
  0xf9   :  { %1740 = vmatpush.bf16.msra.mxu0 %v3022_v42 }
  0xfa   :  { %1589 = vmatpush.bf16.msrb.mxu3 %v2661_v1 }
  0xfb   :  { %v1026_v46 = vpop.f32.mrf.mxu2  ;;  %v1002_v49 = vpop.f32.mrf.mxu0 }
  0xfc   :  { %v1027_v47 = vadd.f32 %v1026_v46, %v1014_v43  ;;  %v1039_v60 = vpop.f32.mrf.mxu3  ;;  %v1015_v51 = vpop.f32.mrf.mxu1  ;;  %v3034_v43 = vld [vmem:[%s3366_s5 + $0x60] sm:$0xff]  ;;  %v3031_v46 = vld [vmem:[%s3366_s5 + $0x48] sm:$0xff] }
  0xfd   :  { %1749 = vmatpush.bf16.msra.mxu1 %v3034_v43  ;;  %v3044_v51 = vld [vmem:[#allocation6 + $0x30] sm:$0xff] }
  0xfe   :  { %v1040_v48 = vadd.f32 %v1039_v60, %v1027_v47  ;;  %1590 = vmatpush.bf16.msrb.mxu3 %v2653_v4  ;;  %v1167_v47 = vld [vmem:[%s3365_s4] sm:$0x3] }
  0xff   :  { %v1169_v58 = vperm.slane %v1167_v47, 0  ;;  %v1170_v62 = vperm.slane %v1167_v47, 1 }
 0x100   :  { %v1097_v52 = vmax.f32 %v1040_v48, 0.0  ;;  %v3045_v48 = vld [vmem:[#allocation6 + $0x38] sm:$0xff] }
 0x101   :  { %1750 = vmatpush.bf16.msra.mxu1 %v3033_v57 }
 0x102   :  { %v1101_v56 = vpack.c.bf16 %v1097_v52, %v1097_v52  ;;  %1591 = vmatpush.bf16.msrb.mxu3 %v2645_v7 }
 0x103   :  { %v1028_v63 = vpop.f32.mrf.mxu2 }
 0x104   :  { %1527 = vmatmul.bf16.vlgmr.msra.gmra.mxu2 %v1101_v56  ;;  %v1041_v0 = vpop.f32.mrf.mxu3 }
 0x105   :  { %1751 = vmatpush.bf16.msra.mxu1 %v3032_v44  ;;  %1829 = vmatpush.bf16.msra.mxu2 %v3045_v48 }
 0x109   :  { %1752 = vmatpush.bf16.msra.mxu1 %v3031_v46  ;;  %1830 = vmatpush.bf16.msra.mxu2 %v3044_v51 }
 0x10d   :  { %1753 = vmatpush.bf16.msra.mxu1 %v3030_v54 }
 0x113   :  { %v1052_v9 = vpop.f32.mrf.mxu0 }
 0x114   :  { %v1053_v10 = vadd.f32 %v1052_v9, %v242_v8  ;;  %v1065_v11 = vpop.f32.mrf.mxu1  ;;  %1579 = vmatmul.bf16.vlgmr.msrb.gmra.mxu2 %v1101_v56  ;;  %v3043_v8 = vld [vmem:[#allocation6 + $0x28] sm:$0xff]  ;;  %v3042_v9 = vld [vmem:[#allocation6 + $0x20] sm:$0xff] }
 0x115   :  { %1831 = vmatpush.bf16.msra.mxu2 %v3043_v8 }
 0x116   :  { %v1066_v12 = vadd.f32 %v1065_v11, %v1053_v10  ;;  %v3041_v10 = vld [vmem:[#allocation6 + $0x18] sm:$0xff]  ;;  %v3040_v11 = vld [vmem:[#allocation6 + $0x10] sm:$0xff] }
 0x119   :  { %1832 = vmatpush.bf16.msra.mxu2 %v3042_v9 }
 0x11b   :  { %v1078_v13 = vpop.f32.mrf.mxu2  ;;  %v1054_v16 = vpop.f32.mrf.mxu0 }
 0x11c   :  { %v1079_v14 = vadd.f32 %v1078_v13, %v1066_v12  ;;  %v1091_v15 = vpop.f32.mrf.mxu3  ;;  %v1067_v17 = vpop.f32.mrf.mxu1  ;;  %v3039_v12 = vld [vmem:[#allocation6 + $0x8] sm:$0xff]  ;;  %v3038_v13 = vld [vmem:[#allocation6] sm:$0xff] }
 0x11d   :  { %1833 = vmatpush.bf16.msra.mxu2 %v3041_v10  ;;  %v3051_v16 = vld [vmem:[#allocation7 + $0x28] sm:$0xff] }
 0x11e   :  { %v1092_v18 = vadd.f32 %v1091_v15, %v1079_v14  ;;  %v3053_v14 = vld [vmem:[#allocation7 + $0x38] sm:$0xff]  ;;  %v3052_v15 = vld [vmem:[#allocation7 + $0x30] sm:$0xff] }
 0x120   :  { %v1098_v19 = vmax.f32 %v1092_v18, 0.0  ;;  %v3050_v18 = vld [vmem:[#allocation7 + $0x20] sm:$0xff] }
 0x121   :  { %1834 = vmatpush.bf16.msra.mxu2 %v3040_v11 }
 0x122   :  { %v1102_v21 = vpack.c.bf16 %v1098_v19, %v1098_v19  ;;  %v3049_v19 = vld [vmem:[#allocation7 + $0x18] sm:$0xff] }
 0x123   :  { %v1080_v22 = vpop.f32.mrf.mxu2 }
 0x124   :  { %v1093_v23 = vpop.f32.mrf.mxu3  ;;  %1540 = vmatmul.bf16.vlgmr.msra.gmra.mxu3 %v1102_v21  ;;  %v3064_v22 = vld [vmem:[%s3367_s6] ss:$0 sm:$0xff] }
 0x125   :  { %1835 = vmatpush.bf16.msra.mxu2 %v3039_v12  ;;  %1912 = vmatpush.bf16.msra.mxu3 %v3053_v14 }
 0x129   :  { %1836 = vmatpush.bf16.msra.mxu2 %v3038_v13  ;;  %1913 = vmatpush.bf16.msra.mxu3 %v3052_v15 }
 0x12d   :  { %1914 = vmatpush.bf16.msra.mxu3 %v3051_v16 }
 0x131   :  { %1915 = vmatpush.bf16.msra.mxu3 %v3050_v18 }
 0x134   :  { %1592 = vmatmul.bf16.vlgmr.msrb.gmra.mxu3 %v1102_v21 }
 0x135   :  { %1916 = vmatpush.bf16.msra.mxu3 %v3049_v19 }
 0x139   :  { %1917 = vmatpush.bf16.msra.mxu3 %v3048_v28 }
 0x142   :  { %v1502_v24 = vpop.f32.mrf.mxu0 }
 0x143   :  { %v1503_v49 = vadd.f32 %v1502_v24, %v1169_v58 }
 0x14a   :  { %v1504_v20 = vpop.f32.mrf.mxu0 }
 0x153   :  { %v1554_v25 = vpop.f32.mrf.mxu0 }
 0x154   :  { %v1555_v0 = vadd.f32 %v1554_v25, %v1170_v62 }
 0x15b   :  { %v1556_v26 = vpop.f32.mrf.mxu0 }
 0x161   :  { %v1515_v27 = vpop.f32.mrf.mxu1 }
 0x162   :  { %v1516_v52 = vadd.f32 %v1515_v27, %v1503_v49 }
 0x169   :  { %v1517_v29 = vpop.f32.mrf.mxu1 }
 0x16a   :  { %v3047_v29 = vld [vmem:[#allocation7 + $0x8] sm:$0xff] }
 0x16b   :  { %1918 = vmatpush.bf16.msra.mxu3 %v3047_v29 }
 0x16f   :  { %1919 = vmatpush.bf16.msra.mxu3 %v3046_v30 }
 0x171   :  { %v1567_v32 = vpop.f32.mrf.mxu1 }
 0x172   :  { %v1568_v1 = vadd.f32 %v1567_v32, %v1555_v0 }
 0x179   :  { %v1569_v36 = vpop.f32.mrf.mxu1 }
 0x187   :  { %v1528_v41 = vpop.f32.mrf.mxu2 }
 0x188   :  { %v1529_v53 = vadd.f32 %v1528_v41, %v1516_v52 }
 0x18f   :  { %v1530_v45 = vpop.f32.mrf.mxu2 }
 0x197   :  { %v1580_v60 = vpop.f32.mrf.mxu2 }
 0x198   :  { %v1581_v2 = vadd.f32 %v1580_v60, %v1568_v1 }
 0x19f   :  { %v1582_v50 = vpop.f32.mrf.mxu2 }
 0x1a7   :  { %v1541_v55 = vpop.f32.mrf.mxu3 }
 0x1a8   :  { %v1542_v56 = vadd.f32 %v1541_v55, %v1529_v53 }
 0x1aa   :  { %v1597_v59 = vmax.f32 %v1542_v56, 0.0 }
 0x1ac   :  { %v1599_v61 = vpack.c.bf16 %v1597_v59, %v1597_v59 }
 0x1ae   :  { %1741 = vmatmul.bf16.vlgmr.msra.gmra.mxu0 %v1599_v61 }
 0x1af   :  { %v1543_v63 = vpop.f32.mrf.mxu3 }
 0x1b7   :  { %v1593_v3 = vpop.f32.mrf.mxu3 }
 0x1b8   :  { %v1594_v4 = vadd.f32 %v1593_v3, %v1581_v2 }
 0x1ba   :  { %v1598_v5 = vmax.f32 %v1594_v4, 0.0 }
 0x1bc   :  { %v1600_v6 = vpack.c.bf16 %v1598_v5, %v1598_v5 }
 0x1be   :  { %1754 = vmatmul.bf16.vlgmr.msra.gmra.mxu1 %v1600_v6 }
 0x1bf   :  { %v1595_v7 = vpop.f32.mrf.mxu3 }
 0x22b   :  { %v1742_v17 = vpop.f32.mrf.mxu0 }
 0x22c   :  { %v1743_v23 = vadd.f32 %v3064_v22, %v1742_v17 }
 0x233   :  { %v1744_v21 = vpop.f32.mrf.mxu0 }
 0x23b   :  { %v1755_v24 = vpop.f32.mrf.mxu1 }
 0x23c   :  { %v1756_v20 = vadd.f32 %v1755_v24, %v1743_v23 }
 0x23e   :  { %v1759_v25 = vmax.f32 %v1756_v20, 0.0 }
 0x240   :  { %v1760_v26 = vpack.c.bf16 %v1759_v25, %v1759_v25 }
 0x242   :  { %1837 = vmatmul.bf16.vlgmr.msra.gmra.mxu2 %v1760_v26 }
 0x243   :  { %v1757_v27 = vpop.f32.mrf.mxu1 }
 0x2c5   :  { %v1838_v32 = vpop.f32.mrf.mxu2 }
 0x2c6   :  { %v1839_v33 = vadd.f32 %v3065_v31, %v1838_v32 }
 0x2c8   :  { %3067 = vtanh.f32 %v1839_v33 }
 0x2cd   :  { %v1840_v34 = vpop.f32.mrf.mxu2 }
 0x2ce   :  { %v3068_v35 = vpop.eup %3067 }
 0x2cf   :  { %v1843_v36 = vpack.c.bf16 %v3068_v35, %v3068_v35 }
 0x2d1   :  { %1920 = vmatmul.bf16.vlgmr.msra.gmra.mxu3 %v1843_v36 }
 0x354   :  { %v1921_v38 = vpop.f32.mrf.mxu3 }
 0x355   :  { %v1922_v39 = vadd.f32 %v3066_v37, %v1921_v38 }
 0x357   :  { %v1925_v40 = vmax.f32 %v1922_v39, 0.0 }
 0x359   :  { %1926 = vst [vmem:[%s3372_s11] sm:$0xff] %v1925_v40 }
 0x35c   :  { %v1923_v41 = vpop.f32.mrf.mxu3 }
 0x35d   :  { %1931 = vsyncpa [#allocation3], 1 }
 0x35e   :  { %1932 = vsyncpa [#allocation5], 1 }
 0x35f   :  { %1933 = vsyncpa [#allocation8], 1 }

</bundles_post_ra>
